<compile_context>
chip_gen: v6e
topology: v6e:2x2x1
jax: 0.10.0
libtpu: 0.0.40
codegen_flags: <defaults>
</compile_context>

<pallas_src>
import functools

import jax
import jax.numpy as jnp
import numpy as np
from jax.experimental import pallas as pl
from jax.experimental.pallas import tpu as pltpu

EXPANSION = 4
BN_EPS = 1e-5
# (num_blocks, planes, first-block stride) for layer1..layer4 of ResNet-101.
RESNET101_CFG = ((3, 64, 1), (4, 128, 2), (23, 256, 2), (3, 512, 2))


# ----------------------------------------------------------------------------
# Small static helpers (Python ints at trace time)
# ----------------------------------------------------------------------------
def _round_up(x, m):
    return ((x + m - 1) // m) * m


def _k_tile(K):
    """K tile and padded K extent; both multiples of 128."""
    K_pad = _round_up(K, 128)
    if K_pad <= 1024:
        return K_pad, K_pad
    for tk in (1024, 768, 512, 384, 256, 128):
        if K_pad % tk == 0:
            return tk, K_pad
    return 512, _round_up(K_pad, 512)


def _m_tile(M):
    """Row tile >=128 whenever M allows; pad M rather than shrinking the tile."""
    if M >= 2048:
        tm = 512
    elif M >= 512:
        tm = 256
    elif M >= 128:
        tm = 128
    else:
        tm = _round_up(M, 8)
    return tm, _round_up(M, tm)


def _n_tile(Cout_pad, single_m_block):
    tn = 128
    for cand in (512, 256):
        if Cout_pad % cand == 0:
            tn = cand
            break
    # If the M axis has only one block, keep >=2 blocks on the Cout axis so
    # 2-TensorCore chips (v7x) still have a parallel split to work with.
    if single_m_block and tn == Cout_pad and Cout_pad >= 256:
        tn = Cout_pad // 2
    return tn


def _pad2d(a, rows, cols):
    r, c = a.shape
    if r == rows and c == cols:
        return a
    return jnp.pad(a, ((0, rows - r), (0, cols - c)))


# ----------------------------------------------------------------------------
# Pallas kernels
# ----------------------------------------------------------------------------
def _matmul_bias_kernel(x_ref, w_ref, b_ref, o_ref, acc_ref, *, relu):
    # x: (tm, tk) bf16 patches; w: (tk, tn) bf16; b: (1, tn) f32 folded BN bias
    @pl.when(pl.program_id(2) == 0)
    def _():
        acc_ref[...] = jnp.zeros_like(acc_ref)

    acc_ref[...] += jnp.dot(x_ref[...], w_ref[...],
                            preferred_element_type=jnp.float32)

    @pl.when(pl.program_id(2) == pl.num_programs(2) - 1)
    def _():
        y = acc_ref[...] + b_ref[...]            # f32 epilogue
        if relu:
            y = jnp.maximum(y, 0.0)
        o_ref[...] = y.astype(o_ref.dtype)


# Module-level partials -> stable kernel identity across the many conv sites.
_MATMUL_RELU = functools.partial(_matmul_bias_kernel, relu=True)
_MATMUL_NORELU = functools.partial(_matmul_bias_kernel, relu=False)


def _matmul_bias_res_kernel(x_ref, w_ref, b_ref, r_ref, o_ref, acc_ref):
    @pl.when(pl.program_id(2) == 0)
    def _():
        acc_ref[...] = jnp.zeros_like(acc_ref)

    acc_ref[...] += jnp.dot(x_ref[...], w_ref[...],
                            preferred_element_type=jnp.float32)

    @pl.when(pl.program_id(2) == pl.num_programs(2) - 1)
    def _():
        y = acc_ref[...] + b_ref[...] + r_ref[...].astype(jnp.float32)
        o_ref[...] = jnp.maximum(y, 0.0).astype(o_ref.dtype)


def _maxpool_kernel(ee_ref, eo_ref, oe_ref, oo_ref, o_ref):
    # Even/odd row+col phases of the (-inf)-padded input for one batch element.
    # ee: (1, Ho+1, Wo+1, C)  eo: (1, Ho+1, Wo, C)
    # oe: (1, Ho,   Wo+1, C)  oo: (1, Ho,   Wo, C)
    # Max is exact in bf16 -> no f32 upcast (halves vreg pressure).
    _, Ho, Wo, _ = o_ref.shape
    ee = ee_ref[0]
    eo = eo_ref[0]
    oe = oe_ref[0]
    oo = oo_ref[0]
    m = jnp.maximum(ee[:Ho, :Wo], eo[:Ho, :])            # rows 2h,   cols 2w / 2w+1
    m = jnp.maximum(m, ee[:Ho, 1:Wo + 1])                # row  2h,   col  2w+2
    m = jnp.maximum(m, oe[:, :Wo])                       # row  2h+1, col  2w
    m = jnp.maximum(m, oo)                               # row  2h+1, col  2w+1
    m = jnp.maximum(m, oe[:, 1:Wo + 1])                  # row  2h+1, col  2w+2
    m = jnp.maximum(m, ee[1:Ho + 1, :Wo])                # row  2h+2, col  2w
    m = jnp.maximum(m, eo[1:Ho + 1, :])                  # row  2h+2, col  2w+1
    m = jnp.maximum(m, ee[1:Ho + 1, 1:Wo + 1])           # row  2h+2, col  2w+2
    o_ref[0] = m.astype(o_ref.dtype)


# ----------------------------------------------------------------------------
# Conv(+folded BN)(+residual)(+ReLU).  Weights arrive pre-folded/padded.
# ----------------------------------------------------------------------------
def conv_bn(x, wmat, bias, residual, *, kh, kw, cin, cout, stride, padding,
            relu):
    """x: NHWC bf16; wmat: (K_pad, Cout_pad) bf16; bias: (1, Cout_pad) f32."""
    N, H, W, _ = x.shape
    Ho = (H + 2 * padding - kh) // stride + 1
    Wo = (W + 2 * padding - kw) // stride + 1
    M = N * Ho * Wo
    K = kh * kw * cin

    tk, K_pad = _k_tile(K)
    tm, M_pad = _m_tile(M)
    Cout_pad = _round_up(cout, 128)
    tn = _n_tile(Cout_pad, M_pad // tm == 1)
    assert wmat.shape == (K_pad, Cout_pad), (wmat.shape, K_pad, Cout_pad)
    assert bias.shape == (1, Cout_pad)

    # im2col in XLA (fuses with the surrounding jitted block graph).
    # 1x1 stride-1 convs are a pure reshape (no copy).
    if kh == 1 and kw == 1 and padding == 0:
        xs = x[:, ::stride, ::stride, :] if stride > 1 else x
        patches = xs.reshape(M, cin)
    else:
        xp = jnp.pad(x, ((0, 0), (padding, padding), (padding, padding), (0, 0)))
        cols = [xp[:, i:i + (Ho - 1) * stride + 1:stride,
                      j:j + (Wo - 1) * stride + 1:stride, :]
                for i in range(kh) for j in range(kw)]
        patches = jnp.concatenate(cols, axis=-1).reshape(M, K)
    patches = _pad2d(patches.astype(jnp.bfloat16), M_pad, K_pad)

    grid = (M_pad // tm, Cout_pad // tn, K_pad // tk)
    x_spec = pl.BlockSpec((tm, tk), lambda i, j, k: (i, k))
    w_spec = pl.BlockSpec((tk, tn), lambda i, j, k: (k, j))
    b_spec = pl.BlockSpec((1, tn), lambda i, j, k: (0, j))
    o_spec = pl.BlockSpec((tm, tn), lambda i, j, k: (i, j))

    if residual is None:
        kern = _MATMUL_RELU if relu else _MATMUL_NORELU
        inputs = (patches, wmat, bias)
        in_specs = [x_spec, w_spec, b_spec]
    else:
        r = _pad2d(residual.reshape(M, cout).astype(jnp.bfloat16),
                   M_pad, Cout_pad)
        kern = _matmul_bias_res_kernel
        inputs = (patches, wmat, bias, r)
        in_specs = [x_spec, w_spec, b_spec,
                    pl.BlockSpec((tm, tn), lambda i, j, k: (i, j))]

    out = pl.pallas_call(
        kern,
        out_shape=jax.ShapeDtypeStruct((M_pad, Cout_pad), jnp.bfloat16),
        grid=grid,
        in_specs=in_specs,
        out_specs=o_spec,
        scratch_shapes=[pltpu.VMEM((tm, tn), jnp.float32)],
        compiler_params=pltpu.CompilerParams(
            dimension_semantics=("parallel", "parallel", "arbitrary"),
            vmem_limit_bytes=32 * 1024 * 1024),
    )(*inputs)

    if M_pad == M and Cout_pad == cout:
        return out.reshape(N, Ho, Wo, cout)
    return out[:M, :cout].reshape(N, Ho, Wo, cout)


# ----------------------------------------------------------------------------
# MaxPool2d(kernel_size=3, stride=2, padding=1), NHWC, bf16.
# ----------------------------------------------------------------------------
def maxpool_3x3_s2_p1(x):
    N, H, W, C = x.shape
    Ho = (H + 2 - 3) // 2 + 1
    Wo = (W + 2 - 3) // 2 + 1
    xp = jnp.pad(x, ((0, 0), (1, 1), (1, 1), (0, 0)),
                 constant_values=-jnp.inf)
    # Even/odd phase split (one ~1x copy total instead of a 9x stacked tensor).
    ev = xp[:, 0:2 * Ho + 1:2, :, :]          # even padded rows   (N, Ho+1, Wp, C)
    od = xp[:, 1:2 * Ho:2, :, :]              # odd padded rows    (N, Ho,   Wp, C)
    ee = ev[:, :, 0:2 * Wo + 1:2, :]          # (N, Ho+1, Wo+1, C)
    eo = ev[:, :, 1:2 * Wo:2, :]              # (N, Ho+1, Wo,   C)
    oe = od[:, :, 0:2 * Wo + 1:2, :]          # (N, Ho,   Wo+1, C)
    oo = od[:, :, 1:2 * Wo:2, :]              # (N, Ho,   Wo,   C)

    return pl.pallas_call(
        _maxpool_kernel,
        out_shape=jax.ShapeDtypeStruct((N, Ho, Wo, C), x.dtype),
        grid=(N,),
        in_specs=[
            pl.BlockSpec((1, Ho + 1, Wo + 1, C), lambda n: (n, 0, 0, 0)),
            pl.BlockSpec((1, Ho + 1, Wo, C), lambda n: (n, 0, 0, 0)),
            pl.BlockSpec((1, Ho, Wo + 1, C), lambda n: (n, 0, 0, 0)),
            pl.BlockSpec((1, Ho, Wo, C), lambda n: (n, 0, 0, 0)),
        ],
        out_specs=pl.BlockSpec((1, Ho, Wo, C), lambda n: (n, 0, 0, 0)),
        compiler_params=pltpu.CompilerParams(
            dimension_semantics=("parallel",)),
    )(ee, eo, oe, oo)


# ----------------------------------------------------------------------------
# Parameter construction (deterministic synthetic init, ResNet-101 shapes).
# Eval-mode BN folded into the conv:  w' = w * gamma * rsqrt(var+eps),
# b' = beta - mean * gamma * rsqrt(var+eps).  Weights are reshaped/padded to
# the exact (K_pad, Cout_pad) bf16 matrices the conv kernel consumes.
# ----------------------------------------------------------------------------
def _init_conv_bn(key, kh, kw, cin, cout):
    kw_, kg, kb, km, kv = jax.random.split(key, 5)
    w = jax.random.normal(kw_, (kh, kw, cin, cout), jnp.float32)
    w = w * (1.0 / np.sqrt(kh * kw * cin))
    gamma = 1.0 + 0.1 * jax.random.normal(kg, (cout,), jnp.float32)
    beta = 0.1 * jax.random.normal(kb, (cout,), jnp.float32)
    mean = 0.1 * jax.random.normal(km, (cout,), jnp.float32)
    var = 1.0 + 0.1 * jnp.abs(jax.random.normal(kv, (cout,), jnp.float32))
    scale = gamma * jax.lax.rsqrt(var + BN_EPS)

    K = kh * kw * cin
    _, K_pad = _k_tile(K)
    Cout_pad = _round_up(cout, 128)
    wmat = _pad2d((w * scale).reshape(K, cout).astype(jnp.bfloat16),
                  K_pad, Cout_pad)
    bias = _pad2d((beta - mean * scale).reshape(1, cout).astype(jnp.float32),
                  1, Cout_pad)
    return (wmat, bias)


def _init_block(key, inplanes, planes, downsample):
    keys = jax.random.split(key, 4)
    blk = {
        "c1": _init_conv_bn(keys[0], 1, 1, inplanes, planes),
        "c2": _init_conv_bn(keys[1], 3, 3, planes, planes),
        "c3": _init_conv_bn(keys[2], 1, 1, planes, planes * EXPANSION),
    }
    if downsample:
        blk["ds"] = _init_conv_bn(keys[3], 1, 1, inplanes, planes * EXPANSION)
    return blk


def make_resnet101_params(key):
    k_stem, k1, k2, k3, k4 = jax.random.split(key, 5)
    params = {"stem": _init_conv_bn(k_stem, 7, 7, 3, 64), "layers": []}
    inplanes = 64
    for (nblocks, planes, stride), klayer in zip(RESNET101_CFG,
                                                 (k1, k2, k3, k4)):
        bkeys = jax.random.split(klayer, nblocks)
        blocks = []
        for i in range(nblocks):
            needs_ds = (i == 0) and (stride != 1 or inplanes != planes * EXPANSION)
            blocks.append(_init_block(bkeys[i], inplanes, planes, needs_ds))
            inplanes = planes * EXPANSION
        params["layers"].append(blocks)
    return params


# ----------------------------------------------------------------------------
# Forward pass.  Jitted per-stage so glue (im2col, pads, slices) fuses and
# identically-shaped bottlenecks (e.g. the 22 repeated layer3 blocks) reuse a
# single compiled executable.
# ----------------------------------------------------------------------------
@jax.jit
def _stem_forward(x_nchw, stem):
    x = jnp.transpose(x_nchw, (0, 2, 3, 1)).astype(jnp.bfloat16)   # -> NHWC
    x = conv_bn(x, stem[0], stem[1], None, kh=7, kw=7, cin=3, cout=64,
                stride=2, padding=3, relu=True)                    # conv1+bn1+relu
    return maxpool_3x3_s2_p1(x)                                    # maxpool


@functools.partial(jax.jit, static_argnames=("inplanes", "planes", "stride"))
def _bottleneck(x, blk, *, inplanes, planes, stride):
    out = conv_bn(x, blk["c1"][0], blk["c1"][1], None, kh=1, kw=1,
                  cin=inplanes, cout=planes, stride=1, padding=0, relu=True)
    out = conv_bn(out, blk["c2"][0], blk["c2"][1], None, kh=3, kw=3,
                  cin=planes, cout=planes, stride=stride, padding=1, relu=True)
    if "ds" in blk:
        identity = conv_bn(x, blk["ds"][0], blk["ds"][1], None, kh=1, kw=1,
                           cin=inplanes, cout=planes * EXPANSION,
                           stride=stride, padding=0, relu=False)
    else:
        identity = x
    return conv_bn(out, blk["c3"][0], blk["c3"][1], identity, kh=1, kw=1,
                   cin=planes, cout=planes * EXPANSION, stride=1, padding=0,
                   relu=True)


def resnet101_forward(x_nchw, params):
    """Input NCHW f32; output NCHW f32 feature map (C=2048, H/32, W/32)."""
    x = _stem_forward(x_nchw, params["stem"])
    inplanes = 64
    for (nblocks, planes, stride), blocks in zip(RESNET101_CFG,
                                                 params["layers"]):
        for i, blk in enumerate(blocks):
            x = _bottleneck(x, blk, inplanes=inplanes, planes=planes,
                            stride=stride if i == 0 else 1)
            inplanes = planes * EXPANSION
    return jnp.transpose(x, (0, 3, 1, 2)).astype(jnp.float32)      # back to NCHW


# ----------------------------------------------------------------------------
if __name__ == "__main__":
    key = jax.random.PRNGKey(0)
    k_in, k_par = jax.random.split(key)

    # Small deterministic RGB image batch.
    x = jax.random.normal(k_in, (2, 3, 64, 64), jnp.float32)
    params = make_resnet101_params(k_par)

    out = resnet101_forward(x, params)
    out = jax.block_until_ready(out)

    assert out.shape == (2, 2048, 2, 2), out.shape
    assert out.dtype == jnp.float32
    assert bool(jnp.all(jnp.isfinite(out)))
    print("KERNEL_OK")
</pallas_src>

<mosaic_0001>
module attributes {stable_mosaic.version = 11 : i64} {
  func.func @_matmul_bias_kernel(%arg0: i32, %arg1: i32, %arg2: i32, %arg3: memref<512x256xbf16, #tpu.memory_space<vmem>>, %arg4: memref<256x128xbf16, #tpu.memory_space<vmem>>, %arg5: memref<1x128xf32, #tpu.memory_space<vmem>>, %arg6: memref<512x128xbf16, #tpu.memory_space<vmem>>, %arg7: memref<512x128xf32, #tpu.memory_space<vmem>>) attributes {dimension_semantics = [#tpu.dimension_semantics<parallel>, #tpu.dimension_semantics<parallel>, #tpu.dimension_semantics<arbitrary>], iteration_bounds = array<i64: 4, 1, 1>, scalar_prefetch = 0 : i64, scratch_operands = 1 : i64, tpu.core_type = #tpu.core_type<tc>, window_params = [{transform_indices = @transform_0, window_bounds = array<i64: 512, 256>}, {transform_indices = @transform_1, window_bounds = array<i64: 256, 128>}, {transform_indices = @transform_2, window_bounds = array<i64: 1, 128>}, {transform_indices = @transform_3, window_bounds = array<i64: 512, 128>}]} {
    %c0_i32 = arith.constant 0 : i32
    %0 = arith.cmpi eq, %arg2, %c0_i32 : i32
    %1 = arith.extui %0 : i1 to i32
    %c0_i32_0 = arith.constant 0 : i32
    %2 = arith.cmpi ne, %1, %c0_i32_0 : i32
    scf.if %2 {
      %cst_10 = arith.constant 0.000000e+00 : f32
      %12 = vector.broadcast %cst_10 : f32 to vector<512x128xf32>
      %c0_11 = arith.constant 0 : index
      %c0_12 = arith.constant 0 : index
      %13 = vector.load %arg7[%c0_11, %c0_12] : memref<512x128xf32, #tpu.memory_space<vmem>>, vector<512x128xf32>
      tpu.vector_store %arg7[%c0_11, %c0_12], %12 {strides = array<i32>} : memref<512x128xf32, #tpu.memory_space<vmem>>, vector<512x128xf32>,
    } else {
    }
    %c0 = arith.constant 0 : index
    %c0_1 = arith.constant 0 : index
    %3 = vector.load %arg7[%c0, %c0_1] : memref<512x128xf32, #tpu.memory_space<vmem>>, vector<512x128xf32>
    %c0_2 = arith.constant 0 : index
    %c0_3 = arith.constant 0 : index
    %4 = vector.load %arg3[%c0_2, %c0_3] : memref<512x256xbf16, #tpu.memory_space<vmem>>, vector<512x256xbf16>
    %c0_4 = arith.constant 0 : index
    %c0_5 = arith.constant 0 : index
    %5 = vector.load %arg4[%c0_4, %c0_5] : memref<256x128xbf16, #tpu.memory_space<vmem>>, vector<256x128xbf16>
    %cst = arith.constant dense<0.000000e+00> : vector<512x128xf32>
    %6 = tpu.matmul %4, %5, %cst {dimension_numbers = #tpu.dot_dimension_numbers<[1], [0], [0], [1], [0, 0, 1, 1], [], []>} : vector<512x256xbf16>, vector<256x128xbf16>, vector<512x128xf32> -> vector<512x128xf32>
    %7 = arith.addf %3, %6 : vector<512x128xf32>
    %c0_6 = arith.constant 0 : index
    %c0_7 = arith.constant 0 : index
    %8 = vector.load %arg7[%c0_6, %c0_7] : memref<512x128xf32, #tpu.memory_space<vmem>>, vector<512x128xf32>
    tpu.vector_store %arg7[%c0_6, %c0_7], %7 {strides = array<i32>} : memref<512x128xf32, #tpu.memory_space<vmem>>, vector<512x128xf32>,
    %c0_i32_8 = arith.constant 0 : i32
    %9 = arith.cmpi eq, %arg2, %c0_i32_8 : i32
    %10 = arith.extui %9 : i1 to i32
    %c0_i32_9 = arith.constant 0 : i32
    %11 = arith.cmpi ne, %10, %c0_i32_9 : i32
    scf.if %11 {
      %c0_10 = arith.constant 0 : index
      %c0_11 = arith.constant 0 : index
      %12 = vector.load %arg7[%c0_10, %c0_11] : memref<512x128xf32, #tpu.memory_space<vmem>>, vector<512x128xf32>
      %c0_12 = arith.constant 0 : index
      %c0_13 = arith.constant 0 : index
      %13 = vector.load %arg5[%c0_12, %c0_13] : memref<1x128xf32, #tpu.memory_space<vmem>>, vector<1x128xf32>
      %14 = vector.broadcast %13 : vector<1x128xf32> to vector<512x128xf32>
      %15 = arith.addf %12, %14 : vector<512x128xf32>
      %cst_14 = arith.constant 0.000000e+00 : f32
      %16 = vector.broadcast %cst_14 : f32 to vector<512x128xf32>
      %17 = arith.maximumf %15, %16 : vector<512x128xf32>
      %18 = arith.truncf %17 : vector<512x128xf32> to vector<512x128xbf16>
      %c0_15 = arith.constant 0 : index
      %c0_16 = arith.constant 0 : index
      %19 = vector.load %arg6[%c0_15, %c0_16] : memref<512x128xbf16, #tpu.memory_space<vmem>>, vector<512x128xbf16>
      tpu.vector_store %arg6[%c0_15, %c0_16], %18 {strides = array<i32>} : memref<512x128xbf16, #tpu.memory_space<vmem>>, vector<512x128xbf16>,
    } else {
    }
    return
  }
  func.func @transform_0(%arg0: i32, %arg1: i32, %arg2: i32) -> (i32, i32) {
    %c0_i32 = arith.constant 0 : i32
    return %arg0, %arg2 : i32, i32
  }
  func.func @transform_1(%arg0: i32, %arg1: i32, %arg2: i32) -> (i32, i32) {
    %c0_i32 = arith.constant 0 : i32
    return %arg2, %arg1 : i32, i32
  }
  func.func @transform_2(%arg0: i32, %arg1: i32, %arg2: i32) -> (i32, i32) {
    %c0_i32 = arith.constant 0 : i32
    %c0_i32_0 = arith.constant 0 : i32
    return %c0_i32, %arg1 : i32, i32
  }
  func.func @transform_3(%arg0: i32, %arg1: i32, %arg2: i32) -> (i32, i32) {
    %c0_i32 = arith.constant 0 : i32
    return %arg0, %arg1 : i32, i32
  }
}

module attributes {stable_mosaic.version = 11 : i64} {
  func.func @_maxpool_kernel(%arg0: i32, %arg1: memref<1x17x17x64xbf16, #tpu.memory_space<vmem>>, %arg2: memref<1x17x16x64xbf16, #tpu.memory_space<vmem>>, %arg3: memref<1x16x17x64xbf16, #tpu.memory_space<vmem>>, %arg4: memref<1x16x16x64xbf16, #tpu.memory_space<vmem>>, %arg5: memref<1x16x16x64xbf16, #tpu.memory_space<vmem>>) attributes {dimension_semantics = [#tpu.dimension_semantics<parallel>], iteration_bounds = array<i64: 2>, scalar_prefetch = 0 : i64, scratch_operands = 0 : i64, tpu.core_type = #tpu.core_type<tc>, window_params = [{transform_indices = @transform_0, window_bounds = array<i64: 1, 17, 17, 64>}, {transform_indices = @transform_1, window_bounds = array<i64: 1, 17, 16, 64>}, {transform_indices = @transform_2, window_bounds = array<i64: 1, 16, 17, 64>}, {transform_indices = @transform_3, window_bounds = array<i64: 1, 16, 16, 64>}, {transform_indices = @transform_4, window_bounds = array<i64: 1, 16, 16, 64>}]} {
    %c0 = arith.constant 0 : index
    %c0_0 = arith.constant 0 : index
    %c0_1 = arith.constant 0 : index
    %c0_2 = arith.constant 0 : index
    %0 = vector.load %arg1[%c0, %c0_0, %c0_1, %c0_2] : memref<1x17x17x64xbf16, #tpu.memory_space<vmem>>, vector<1x17x17x64xbf16>
    %1 = vector.shape_cast %0 : vector<1x17x17x64xbf16> to vector<17x17x64xbf16>
    %c0_3 = arith.constant 0 : index
    %c0_4 = arith.constant 0 : index
    %c0_5 = arith.constant 0 : index
    %c0_6 = arith.constant 0 : index
    %2 = vector.load %arg2[%c0_3, %c0_4, %c0_5, %c0_6] : memref<1x17x16x64xbf16, #tpu.memory_space<vmem>>, vector<1x17x16x64xbf16>
    %3 = vector.shape_cast %2 : vector<1x17x16x64xbf16> to vector<17x16x64xbf16>
    %c0_7 = arith.constant 0 : index
    %c0_8 = arith.constant 0 : index
    %c0_9 = arith.constant 0 : index
    %c0_10 = arith.constant 0 : index
    %4 = vector.load %arg3[%c0_7, %c0_8, %c0_9, %c0_10] : memref<1x16x17x64xbf16, #tpu.memory_space<vmem>>, vector<1x16x17x64xbf16>
    %5 = vector.shape_cast %4 : vector<1x16x17x64xbf16> to vector<16x17x64xbf16>
    %c0_11 = arith.constant 0 : index
    %c0_12 = arith.constant 0 : index
    %c0_13 = arith.constant 0 : index
    %c0_14 = arith.constant 0 : index
    %6 = vector.load %arg4[%c0_11, %c0_12, %c0_13, %c0_14] : memref<1x16x16x64xbf16, #tpu.memory_space<vmem>>, vector<1x16x16x64xbf16>
    %7 = vector.shape_cast %6 : vector<1x16x16x64xbf16> to vector<16x16x64xbf16>
    %8 = vector.extract_strided_slice %1 {offsets = [0, 0, 0], sizes = [16, 16, 64], strides = [1, 1, 1]} : vector<17x17x64xbf16> to vector<16x16x64xbf16>
    %9 = vector.extract_strided_slice %3 {offsets = [0, 0, 0], sizes = [16, 16, 64], strides = [1, 1, 1]} : vector<17x16x64xbf16> to vector<16x16x64xbf16>
    %10 = arith.maximumf %8, %9 : vector<16x16x64xbf16>
    %11 = vector.extract_strided_slice %1 {offsets = [0, 1, 0], sizes = [16, 16, 64], strides = [1, 1, 1]} : vector<17x17x64xbf16> to vector<16x16x64xbf16>
    %12 = arith.maximumf %10, %11 : vector<16x16x64xbf16>
    %13 = vector.extract_strided_slice %5 {offsets = [0, 0, 0], sizes = [16, 16, 64], strides = [1, 1, 1]} : vector<16x17x64xbf16> to vector<16x16x64xbf16>
    %14 = arith.maximumf %12, %13 : vector<16x16x64xbf16>
    %15 = arith.maximumf %14, %7 : vector<16x16x64xbf16>
    %16 = vector.extract_strided_slice %5 {offsets = [0, 1, 0], sizes = [16, 16, 64], strides = [1, 1, 1]} : vector<16x17x64xbf16> to vector<16x16x64xbf16>
    %17 = arith.maximumf %15, %16 : vector<16x16x64xbf16>
    %18 = vector.extract_strided_slice %1 {offsets = [1, 0, 0], sizes = [16, 16, 64], strides = [1, 1, 1]} : vector<17x17x64xbf16> to vector<16x16x64xbf16>
    %19 = arith.maximumf %17, %18 : vector<16x16x64xbf16>
    %20 = vector.extract_strided_slice %3 {offsets = [1, 0, 0], sizes = [16, 16, 64], strides = [1, 1, 1]} : vector<17x16x64xbf16> to vector<16x16x64xbf16>
    %21 = arith.maximumf %19, %20 : vector<16x16x64xbf16>
    %22 = vector.extract_strided_slice %1 {offsets = [1, 1, 0], sizes = [16, 16, 64], strides = [1, 1, 1]} : vector<17x17x64xbf16> to vector<16x16x64xbf16>
    %23 = arith.maximumf %21, %22 : vector<16x16x64xbf16>
    %c0_15 = arith.constant 0 : index
    %c0_16 = arith.constant 0 : index
    %c0_17 = arith.constant 0 : index
    %c0_18 = arith.constant 0 : index
    %24 = vector.load %arg5[%c0_15, %c0_16, %c0_17, %c0_18] : memref<1x16x16x64xbf16, #tpu.memory_space<vmem>>, vector<1x16x16x64xbf16>
    %25 = vector.shape_cast %24 : vector<1x16x16x64xbf16> to vector<16x16x64xbf16>
    %26 = vector.shape_cast %23 : vector<16x16x64xbf16> to vector<1x16x16x64xbf16>
    tpu.vector_store %arg5[%c0_15, %c0_16, %c0_17, %c0_18], %26 {strides = array<i32>} : memref<1x16x16x64xbf16, #tpu.memory_space<vmem>>, vector<1x16x16x64xbf16>,
    return
  }
  func.func @transform_0(%arg0: i32) -> (i32, i32, i32, i32) {
    %c0_i32 = arith.constant 0 : i32
    %c0_i32_0 = arith.constant 0 : i32
    %c0_i32_1 = arith.constant 0 : i32
    %c0_i32_2 = arith.constant 0 : i32
    return %arg0, %c0_i32, %c0_i32_0, %c0_i32_1 : i32, i32, i32, i32
  }
  func.func @transform_1(%arg0: i32) -> (i32, i32, i32, i32) {
    %c0_i32 = arith.constant 0 : i32
    %c0_i32_0 = arith.constant 0 : i32
    %c0_i32_1 = arith.constant 0 : i32
    %c0_i32_2 = arith.constant 0 : i32
    return %arg0, %c0_i32, %c0_i32_0, %c0_i32_1 : i32, i32, i32, i32
  }
  func.func @transform_2(%arg0: i32) -> (i32, i32, i32, i32) {
    %c0_i32 = arith.constant 0 : i32
    %c0_i32_0 = arith.constant 0 : i32
    %c0_i32_1 = arith.constant 0 : i32
    %c0_i32_2 = arith.constant 0 : i32
    return %arg0, %c0_i32, %c0_i32_0, %c0_i32_1 : i32, i32, i32, i32
  }
  func.func @transform_3(%arg0: i32) -> (i32, i32, i32, i32) {
    %c0_i32 = arith.constant 0 : i32
    %c0_i32_0 = arith.constant 0 : i32
    %c0_i32_1 = arith.constant 0 : i32
    %c0_i32_2 = arith.constant 0 : i32
    return %arg0, %c0_i32, %c0_i32_0, %c0_i32_1 : i32, i32, i32, i32
  }
  func.func @transform_4(%arg0: i32) -> (i32, i32, i32, i32) {
    %c0_i32 = arith.constant 0 : i32
    %c0_i32_0 = arith.constant 0 : i32
    %c0_i32_1 = arith.constant 0 : i32
    %c0_i32_2 = arith.constant 0 : i32
    return %arg0, %c0_i32, %c0_i32_0, %c0_i32_1 : i32, i32, i32, i32
  }
}

</mosaic_0001>

<bundles_post_ra>
// kernel: _stem_forward.2
= control target key start
LH: loop header
LB: loop body
LE: loop exit
PB: predicated region body
PF: predicated region fallthrough
CT: control target
= control target key end

     0   :  { %s2594_s12 = smov 0   ;;  %s2596_s13 = smov 0   ;;  %s2880_s0 = inlined_call_operand.vmem [shape: bf16[2048,256], index: 0, kind: input, shape index: {}]   ;;  %s2881_s1 = inlined_call_operand.vmem [shape: bf16[256,128], index: 1, kind: input, shape index: {}]   ;;  %s2882_s2 = inlined_call_operand.vmem [shape: f32[1,128], index: 2, kind: input, shape index: {}]   ;;  %s2883_s3 = inlined_call_operand.vmem [shape: bf16[2048,128], index: 3, kind: output, shape index: {}]  }
   0x1   :  { %s2598_s14 = smov 0  }
   0x2 LB: > { %s32_s15 = sadd.s32 1, %s2567_s13  ;;  %p1971_p0 = scmp.ge.s32.totalorder %s2571_s14, 1  ;;  %s2571_s14 = sphi %s2598_s14, %s13_s14   ;;  %s2567_s13 = sphi %s2596_s13, %s2885_s13   ;;  %s2563_s12 = sphi %s2594_s12, %s2884_s12  }
   0x3   : > { %p34_p1 = scmp.ge.s32.totalorder %s32_s15, 4  ;;  %p191_p2 = scmp.lt.s32.totalorder %s2571_s14, 5 }
   0x5   : > { %s2887_s15 = smov (%p34_p1, %s32_s15), 0  ;;  %p192_p3 = pnand %p1971_p0, %p191_p2 }
   0x6   : > { %s1972_s18 = sshll.u32 (!%p192_p3), %s2563_s12, 6 }
   0x7   : > { %195 = sbr.rel (%p192_p3) target bundleno = 401 (0x191), region = 32  ;;  %p236_p4 = scmp.lt.s32.totalorder (!%p192_p3), %s1972_s18, 255 }
   0xc   : > { %v2437_v0 = vld [vmem:[%s2881_s1 + $0x38] sm:$0xff]   ;;  %v2573_v1 = vmov 0   ;;  %v2438_v2 = vld [vmem:[%s2881_s1 + $0x30] sm:$0xff]   ;;  %v2439_v3 = vld [vmem:[%s2881_s1 + $0x28] sm:$0xff]   ;;  %s2889_s18 = smov (!%p236_p4, %s1972_s18), 255 }
   0xd   : > { %912 = vmatprep.subr.bf16.mxu0 %v2573_v1  ;;  %2380 = vmatprep.subr.bf16.mxu1 %v2573_v1  ;;  %v2440_v4 = vld [vmem:[%s2881_s1 + $0x20] sm:$0xff]   ;;  %s2124_s25 = sshll.u32 %s2889_s18, 3  ;;  %v2441_v5 = vld [vmem:[%s2881_s1 + $0x18] sm:$0xff]   ;;  %v2442_v7 = vld [vmem:[%s2881_s1 + $0x10] sm:$0xff]   ;;  %s1976_s6 = sshll.u32 %s2889_s18, 2 }
   0xe   : > { %913 = vmatpush1.bf16.msra.mxu0 %v2437_v0  ;;  %2396 = vmatpush1.bf16.msra.mxu1 %v2437_v0  ;;  %s2641_s30 = scalar_lea.vmem %s2880_s0, %s2124_s25  ;;  %v2443_v9 = vld [vmem:[%s2881_s1 + $0x8] sm:$0xff]   ;;  %v2444_v10 = vld [vmem:[%s2881_s1] sm:$0xff]   ;;  %v2445_v11 = vld [vmem:[%s2881_s1 + $0x78] sm:$0xff]   ;;  %s2777_s8 = scalar_lea.vmem %s2883_s3, %s1976_s6 }
   0xf   : > { %914 = vmatprep.subr.bf16.mxu0 %v2573_v1  ;;  %2381 = vmatprep.subr.bf16.mxu1 %v2573_v1  ;;  %v2455_v6 = vld [vmem:[%s2641_s30 + $0x4] ss:$8 sps:$4 sm:$0xff]   ;;  %v2446_v12 = vld [vmem:[%s2881_s1 + $0x70] sm:$0xff]   ;;  %v2449_v15 = vld [vmem:[%s2881_s1 + $0x58] sm:$0xff]  }
  0x10   : > { %v2458_v8 = vld [vmem:[%s2641_s30 + $0x104] ss:$8 sps:$4 sm:$0xff]   ;;  %944 = vmatprep.mubr.bf16.mxu0 %v2455_v6  ;;  %v2450_v16 = vld [vmem:[%s2881_s1 + $0x50] sm:$0xff]   ;;  %v2453_v19 = vld [vmem:[%s2641_s30] ss:$8 sps:$4 sm:$0xff]  }
  0x11   : > { %1072 = vmatprep.mubr.bf16.mxu1 %v2458_v8  ;;  %v2447_v13 = vld [vmem:[%s2881_s1 + $0x68] sm:$0xff]   ;;  %v2448_v14 = vld [vmem:[%s2881_s1 + $0x60] sm:$0xff]   ;;  %v2459_v21 = vld [vmem:[%s2641_s30 + $0x14] ss:$8 sps:$4 sm:$0xff]  }
  0x12   : > { %915 = vmatpush1.bf16.msra.mxu0 %v2438_v2  ;;  %2397 = vmatpush1.bf16.msra.mxu1 %v2438_v2  ;;  %v2451_v17 = vld [vmem:[%s2881_s1 + $0x48] sm:$0xff]   ;;  %v2452_v18 = vld [vmem:[%s2881_s1 + $0x40] sm:$0xff]   ;;  %v2461_v22 = vld [vmem:[%s2641_s30 + $0x114] ss:$8 sps:$4 sm:$0xff]  }
  0x13   : > { %916 = vmatprep.subr.bf16.mxu0 %v2573_v1  ;;  %2382 = vmatprep.subr.bf16.mxu1 %v2573_v1  ;;  %v2456_v20 = vld [vmem:[%s2641_s30 + $0x100] ss:$8 sps:$4 sm:$0xff]   ;;  %v2463_v23 = vld [vmem:[%s2641_s30 + $0x10] ss:$8 sps:$4 sm:$0xff]   ;;  %v2465_v25 = vld [vmem:[%s2641_s30 + $0x24] ss:$8 sps:$4 sm:$0xff]  }
  0x14   : > { %v2464_v24 = vld [vmem:[%s2641_s30 + $0x110] ss:$8 sps:$4 sm:$0xff]   ;;  %v2467_v26 = vld [vmem:[%s2641_s30 + $0x124] ss:$8 sps:$4 sm:$0xff]   ;;  %v2469_v27 = vld [vmem:[%s2641_s30 + $0x20] ss:$8 sps:$4 sm:$0xff]  }
  0x15   : > { %v2470_v28 = vld [vmem:[%s2641_s30 + $0x120] ss:$8 sps:$4 sm:$0xff]   ;;  %v2471_v29 = vld [vmem:[%s2641_s30 + $0x34] ss:$8 sps:$4 sm:$0xff]   ;;  %v2475_v31 = vld [vmem:[%s2641_s30 + $0x30] ss:$8 sps:$4 sm:$0xff]  }
  0x16   : > { %917 = vmatpush1.bf16.msra.mxu0 %v2439_v3  ;;  %2398 = vmatpush1.bf16.msra.mxu1 %v2439_v3  ;;  %v2473_v30 = vld [vmem:[%s2641_s30 + $0x134] ss:$8 sps:$4 sm:$0xff]   ;;  %v2476_v32 = vld [vmem:[%s2641_s30 + $0x130] ss:$8 sps:$4 sm:$0xff]   ;;  %v2477_v33 = vld [vmem:[%s2641_s30 + $0x44] ss:$8 sps:$4 sm:$0xff]  }
  0x17   : > { %918 = vmatprep.subr.bf16.mxu0 %v2573_v1  ;;  %2383 = vmatprep.subr.bf16.mxu1 %v2573_v1  ;;  %v2479_v34 = vld [vmem:[%s2641_s30 + $0x144] ss:$8 sps:$4 sm:$0xff]   ;;  %v2481_v35 = vld [vmem:[%s2641_s30 + $0x40] ss:$8 sps:$4 sm:$0xff]   ;;  %v2483_v37 = vld [vmem:[%s2641_s30 + $0x54] ss:$8 sps:$4 sm:$0xff]  }
  0x18   : > { %v2482_v36 = vld [vmem:[%s2641_s30 + $0x140] ss:$8 sps:$4 sm:$0xff]   ;;  %v2485_v38 = vld [vmem:[%s2641_s30 + $0x154] ss:$8 sps:$4 sm:$0xff]   ;;  %v2487_v39 = vld [vmem:[%s2641_s30 + $0x50] ss:$8 sps:$4 sm:$0xff]  }
  0x19   : > { %v2488_v40 = vld [vmem:[%s2641_s30 + $0x150] ss:$8 sps:$4 sm:$0xff]   ;;  %v2489_v41 = vld [vmem:[%s2641_s30 + $0x64] ss:$8 sps:$4 sm:$0xff]   ;;  %v2493_v43 = vld [vmem:[%s2641_s30 + $0x60] ss:$8 sps:$4 sm:$0xff]  }
  0x1a   : > { %919 = vmatpush1.bf16.msra.mxu0 %v2440_v4  ;;  %2399 = vmatpush1.bf16.msra.mxu1 %v2440_v4  ;;  %v2491_v42 = vld [vmem:[%s2641_s30 + $0x164] ss:$8 sps:$4 sm:$0xff]   ;;  %v2494_v44 = vld [vmem:[%s2641_s30 + $0x160] ss:$8 sps:$4 sm:$0xff]   ;;  %v2495_v45 = vld [vmem:[%s2641_s30 + $0x74] ss:$8 sps:$4 sm:$0xff]  }
  0x1b   : > { %920 = vmatprep.subr.bf16.mxu0 %v2573_v1  ;;  %2384 = vmatprep.subr.bf16.mxu1 %v2573_v1  ;;  %v2497_v46 = vld [vmem:[%s2641_s30 + $0x174] ss:$8 sps:$4 sm:$0xff]   ;;  %v2499_v47 = vld [vmem:[%s2641_s30 + $0x70] ss:$8 sps:$4 sm:$0xff]   ;;  %v2501_v49 = vld [vmem:[%s2641_s30 + $0x84] ss:$8 sps:$4 sm:$0xff]  }
  0x1c   : > { %v2500_v48 = vld [vmem:[%s2641_s30 + $0x170] ss:$8 sps:$4 sm:$0xff]   ;;  %v2503_v50 = vld [vmem:[%s2641_s30 + $0x184] ss:$8 sps:$4 sm:$0xff]   ;;  %v2505_v51 = vld [vmem:[%s2641_s30 + $0x80] ss:$8 sps:$4 sm:$0xff]  }
  0x1d   : > { %v2506_v52 = vld [vmem:[%s2641_s30 + $0x180] ss:$8 sps:$4 sm:$0xff]   ;;  %v2507_v53 = vld [vmem:[%s2641_s30 + $0x94] ss:$8 sps:$4 sm:$0xff]   ;;  %v2511_v55 = vld [vmem:[%s2641_s30 + $0x90] ss:$8 sps:$4 sm:$0xff]  }
  0x1e   : > { %921 = vmatpush1.bf16.msra.mxu0 %v2441_v5  ;;  %2400 = vmatpush1.bf16.msra.mxu1 %v2441_v5  ;;  %v2509_v54 = vld [vmem:[%s2641_s30 + $0x194] ss:$8 sps:$4 sm:$0xff]   ;;  %v2512_v56 = vld [vmem:[%s2641_s30 + $0x190] ss:$8 sps:$4 sm:$0xff]   ;;  %v2513_v57 = vld [vmem:[%s2641_s30 + $0xa4] ss:$8 sps:$4 sm:$0xff]  }
  0x1f   : > { %922 = vmatprep.subr.bf16.mxu0 %v2573_v1  ;;  %2385 = vmatprep.subr.bf16.mxu1 %v2573_v1  ;;  %v2515_v58 = vld [vmem:[%s2641_s30 + $0x1a4] ss:$8 sps:$4 sm:$0xff]   ;;  %v2517_v59 = vld [vmem:[%s2641_s30 + $0xa0] ss:$8 sps:$4 sm:$0xff]   ;;  %v2519_v61 = vld [vmem:[%s2641_s30 + $0xb4] ss:$8 sps:$4 sm:$0xff]  }
  0x20   : > { %v2518_v60 = vld [vmem:[%s2641_s30 + $0x1a0] ss:$8 sps:$4 sm:$0xff]   ;;  %v2521_v62 = vld [vmem:[%s2641_s30 + $0x1b4] ss:$8 sps:$4 sm:$0xff]   ;;  %v2523_v63 = vld [vmem:[%s2641_s30 + $0xb0] ss:$8 sps:$4 sm:$0xff]  }
  0x21   : > { %v2524_v0 = vld [vmem:[%s2641_s30 + $0x1b0] ss:$8 sps:$4 sm:$0xff]   ;;  %v2527_v2 = vld [vmem:[%s2641_s30 + $0x1c4] ss:$8 sps:$4 sm:$0xff]   ;;  %v2529_v3 = vld [vmem:[%s2641_s30 + $0xc0] ss:$8 sps:$4 sm:$0xff]  }
  0x22   : > { %923 = vmatpush1.bf16.msra.mxu0 %v2442_v7  ;;  %2401 = vmatpush1.bf16.msra.mxu1 %v2442_v7  ;;  %v2530_v4 = vld [vmem:[%s2641_s30 + $0x1c0] ss:$8 sps:$4 sm:$0xff]   ;;  %v2531_v5 = vld [vmem:[%s2641_s30 + $0xd4] ss:$8 sps:$4 sm:$0xff]   ;;  %v2535_v7 = vld [vmem:[%s2641_s30 + $0xd0] ss:$8 sps:$4 sm:$0xff]  }
  0x23   : > { %924 = vmatprep.subr.bf16.mxu0 %v2573_v1  ;;  %2386 = vmatprep.subr.bf16.mxu1 %v2573_v1  ;;  %v2533_v6 = vld [vmem:[%s2641_s30 + $0x1d4] ss:$8 sps:$4 sm:$0xff]   ;;  %v2536_v8 = vld [vmem:[%s2641_s30 + $0x1d0] ss:$8 sps:$4 sm:$0xff]  }
  0x26   : > { %925 = vmatpush1.bf16.msra.mxu0 %v2443_v9  ;;  %2402 = vmatpush1.bf16.msra.mxu1 %v2443_v9  ;;  %v2537_v9 = vld [vmem:[%s2641_s30 + $0xe4] ss:$8 sps:$4 sm:$0xff]  }
  0x27   : > { %926 = vmatprep.subr.bf16.mxu0 %v2573_v1  ;;  %2387 = vmatprep.subr.bf16.mxu1 %v2573_v1 }
  0x2a   : > { %927 = vmatpush1.bf16.msra.mxu0 %v2444_v10  ;;  %2403 = vmatpush1.bf16.msra.mxu1 %v2444_v10  ;;  %v2539_v10 = vld [vmem:[%s2641_s30 + $0x1e4] ss:$8 sps:$4 sm:$0xff]  }
  0x2b   : > { %928 = vmatprep.subr.bf16.mxu0 %v2573_v1  ;;  %2388 = vmatprep.subr.bf16.mxu1 %v2573_v1 }
  0x2e   : > { %929 = vmatpush2.bf16.msra.mxu0 %v2445_v11  ;;  %2404 = vmatpush2.bf16.msra.mxu1 %v2445_v11  ;;  %v2541_v11 = vld [vmem:[%s2641_s30 + $0xe0] ss:$8 sps:$4 sm:$0xff]  }
  0x2f   : > { %930 = vmatprep.subr.bf16.mxu0 %v2573_v1  ;;  %2389 = vmatprep.subr.bf16.mxu1 %v2573_v1 }
  0x32   : > { %931 = vmatpush2.bf16.msra.mxu0 %v2446_v12  ;;  %2405 = vmatpush2.bf16.msra.mxu1 %v2446_v12  ;;  %v2542_v12 = vld [vmem:[%s2641_s30 + $0x1e0] ss:$8 sps:$4 sm:$0xff]  }
  0x33   : > { %932 = vmatprep.subr.bf16.mxu0 %v2573_v1  ;;  %2390 = vmatprep.subr.bf16.mxu1 %v2573_v1 }
  0x36   : > { %933 = vmatpush2.bf16.msra.mxu0 %v2447_v13  ;;  %2406 = vmatpush2.bf16.msra.mxu1 %v2447_v13  ;;  %v2543_v13 = vld [vmem:[%s2641_s30 + $0xf4] ss:$8 sps:$4 sm:$0xff]  }
  0x37   : > { %934 = vmatprep.subr.bf16.mxu0 %v2573_v1  ;;  %2391 = vmatprep.subr.bf16.mxu1 %v2573_v1 }
  0x3a   : > { %935 = vmatpush2.bf16.msra.mxu0 %v2448_v14  ;;  %2407 = vmatpush2.bf16.msra.mxu1 %v2448_v14  ;;  %v2545_v14 = vld [vmem:[%s2641_s30 + $0x1f4] ss:$8 sps:$4 sm:$0xff]  }
  0x3b   : > { %936 = vmatprep.subr.bf16.mxu0 %v2573_v1  ;;  %2392 = vmatprep.subr.bf16.mxu1 %v2573_v1 }
  0x3e   : > { %937 = vmatpush2.bf16.msra.mxu0 %v2449_v15  ;;  %2408 = vmatpush2.bf16.msra.mxu1 %v2449_v15  ;;  %v2547_v15 = vld [vmem:[%s2641_s30 + $0xf0] ss:$8 sps:$4 sm:$0xff]  }
  0x3f   : > { %938 = vmatprep.subr.bf16.mxu0 %v2573_v1  ;;  %2393 = vmatprep.subr.bf16.mxu1 %v2573_v1 }
  0x42   : > { %939 = vmatpush2.bf16.msra.mxu0 %v2450_v16  ;;  %2409 = vmatpush2.bf16.msra.mxu1 %v2450_v16  ;;  %v2548_v16 = vld [vmem:[%s2641_s30 + $0x1f0] ss:$8 sps:$4 sm:$0xff]  }
  0x43   : > { %940 = vmatprep.subr.bf16.mxu0 %v2573_v1  ;;  %2394 = vmatprep.subr.bf16.mxu1 %v2573_v1 }
  0x46   : > { %941 = vmatpush2.bf16.msra.mxu0 %v2451_v17  ;;  %2410 = vmatpush2.bf16.msra.mxu1 %v2451_v17 }
  0x47   : > { %942 = vmatprep.subr.bf16.mxu0 %v2573_v1  ;;  %2395 = vmatprep.subr.bf16.mxu1 %v2573_v1  ;;  %v2525_v1 = vld [vmem:[%s2641_s30 + $0xc4] ss:$8 sps:$4 sm:$0xff]  }
  0x4a   : > { %943 = vmatpush2.bf16.msra.mxu0 %v2452_v18  ;;  %2411 = vmatpush2.bf16.msra.mxu1 %v2452_v18  ;;  %v2767_v18 = vld [vmem:[%s2882_s2] ss:$0 sm:$0xff] }
  0x4d   : > { %945 = vmatmul.mubr.bf16.vlgmr.msra.gmra.mxu0 %v2453_v19  ;;  %1073 = vmatmul.mubr.bf16.vlgmr.msra.gmra.mxu1 %v2456_v20 }
  0x4e   : > { %952 = vmatprep.mubr.bf16.mxu0 %v2459_v21  ;;  %1080 = vmatprep.mubr.bf16.mxu1 %v2461_v22 }
  0x55   : > { %953 = vmatmul.mubr.bf16.gmra.mxu0 %v2463_v23  ;;  %1081 = vmatmul.mubr.bf16.gmra.mxu1 %v2464_v24 }
  0x56   : > { %960 = vmatprep.mubr.bf16.mxu0 %v2465_v25  ;;  %1088 = vmatprep.mubr.bf16.mxu1 %v2467_v26 }
  0x5d   : > { %961 = vmatmul.mubr.bf16.gmra.mxu0 %v2469_v27  ;;  %1089 = vmatmul.mubr.bf16.gmra.mxu1 %v2470_v28 }
  0x5e   : > { %968 = vmatprep.mubr.bf16.mxu0 %v2471_v29  ;;  %1096 = vmatprep.mubr.bf16.mxu1 %v2473_v30 }
  0x65   : > { %969 = vmatmul.mubr.bf16.gmra.mxu0 %v2475_v31  ;;  %1097 = vmatmul.mubr.bf16.gmra.mxu1 %v2476_v32 }
  0x66   : > { %976 = vmatprep.mubr.bf16.mxu0 %v2477_v33  ;;  %1104 = vmatprep.mubr.bf16.mxu1 %v2479_v34 }
  0x6d   : > { %977 = vmatmul.mubr.bf16.gmra.mxu0 %v2481_v35  ;;  %1105 = vmatmul.mubr.bf16.gmra.mxu1 %v2482_v36 }
  0x6e   : > { %984 = vmatprep.mubr.bf16.mxu0 %v2483_v37  ;;  %1112 = vmatprep.mubr.bf16.mxu1 %v2485_v38 }
  0x75   : > { %985 = vmatmul.mubr.bf16.gmra.mxu0 %v2487_v39  ;;  %1113 = vmatmul.mubr.bf16.gmra.mxu1 %v2488_v40 }
  0x76   : > { %992 = vmatprep.mubr.bf16.mxu0 %v2489_v41  ;;  %1120 = vmatprep.mubr.bf16.mxu1 %v2491_v42 }
  0x7d   : > { %993 = vmatmul.mubr.bf16.gmra.mxu0 %v2493_v43  ;;  %1121 = vmatmul.mubr.bf16.gmra.mxu1 %v2494_v44 }
  0x7e   : > { %1000 = vmatprep.mubr.bf16.mxu0 %v2495_v45  ;;  %1128 = vmatprep.mubr.bf16.mxu1 %v2497_v46 }
  0x85   : > { %1001 = vmatmul.mubr.bf16.gmra.mxu0 %v2499_v47  ;;  %1129 = vmatmul.mubr.bf16.gmra.mxu1 %v2500_v48 }
  0x86   : > { %1008 = vmatprep.mubr.bf16.mxu0 %v2501_v49  ;;  %1136 = vmatprep.mubr.bf16.mxu1 %v2503_v50 }
  0x8d   : > { %1009 = vmatmul.mubr.bf16.gmra.mxu0 %v2505_v51  ;;  %1137 = vmatmul.mubr.bf16.gmra.mxu1 %v2506_v52 }
  0x8e   : > { %1016 = vmatprep.mubr.bf16.mxu0 %v2507_v53  ;;  %1144 = vmatprep.mubr.bf16.mxu1 %v2509_v54 }
  0x95   : > { %1017 = vmatmul.mubr.bf16.gmra.mxu0 %v2511_v55  ;;  %1145 = vmatmul.mubr.bf16.gmra.mxu1 %v2512_v56 }
  0x96   : > { %1024 = vmatprep.mubr.bf16.mxu0 %v2513_v57  ;;  %1152 = vmatprep.mubr.bf16.mxu1 %v2515_v58 }
  0x9d   : > { %1025 = vmatmul.mubr.bf16.gmra.mxu0 %v2517_v59  ;;  %1153 = vmatmul.mubr.bf16.gmra.mxu1 %v2518_v60 }
  0x9e   : > { %1032 = vmatprep.mubr.bf16.mxu0 %v2519_v61  ;;  %1160 = vmatprep.mubr.bf16.mxu1 %v2521_v62 }
  0xa5   : > { %1033 = vmatmul.mubr.bf16.gmra.mxu0 %v2523_v63  ;;  %1161 = vmatmul.mubr.bf16.gmra.mxu1 %v2524_v0 }
  0xa6   : > { %1040 = vmatprep.mubr.bf16.mxu0 %v2525_v1  ;;  %1168 = vmatprep.mubr.bf16.mxu1 %v2527_v2 }
  0xad   : > { %1041 = vmatmul.mubr.bf16.gmra.mxu0 %v2529_v3  ;;  %1169 = vmatmul.mubr.bf16.gmra.mxu1 %v2530_v4 }
  0xae   : > { %1048 = vmatprep.mubr.bf16.mxu0 %v2531_v5  ;;  %1176 = vmatprep.mubr.bf16.mxu1 %v2533_v6 }
  0xb5   : > { %1049 = vmatmul.mubr.bf16.gmra.mxu0 %v2535_v7  ;;  %1177 = vmatmul.mubr.bf16.gmra.mxu1 %v2536_v8 }
  0xb6   : > { %1056 = vmatprep.mubr.bf16.mxu0 %v2537_v9  ;;  %1184 = vmatprep.mubr.bf16.mxu1 %v2539_v10 }
  0xbd   : > { %1057 = vmatmul.mubr.bf16.gmra.mxu0 %v2541_v11  ;;  %1185 = vmatmul.mubr.bf16.gmra.mxu1 %v2542_v12 }
  0xbe   : > { %1064 = vmatprep.mubr.bf16.mxu0 %v2543_v13  ;;  %1192 = vmatprep.mubr.bf16.mxu1 %v2545_v14 }
  0xc5   : > { %1065 = vmatmul.mubr.bf16.gmra.mxu0 %v2547_v15  ;;  %1193 = vmatmul.mubr.bf16.gmra.mxu1 %v2548_v16 }
 0x10d   : > { %v946_v17 = vpop.f32.mrf.mxu0  ;;  %v1074_v19 = vpop.f32.mrf.mxu1 }
 0x10e   : > { %v1403_v22 = vadd.f32 %v2767_v18, %v946_v17  ;;  %v1435_v23 = vadd.f32 %v2767_v18, %v1074_v19 }
 0x10f   : > { %v948_v20 = vpop.f32.mrf.mxu0  ;;  %v1076_v21 = vpop.f32.mrf.mxu1 }
 0x110   : > { %v1467_v30 = vmax.f32 %v1403_v22, 0.0  ;;  %v1499_v31 = vmax.f32 %v1435_v23, 0.0 }
 0x111   : > { %v949_v24 = vpop.f32.mrf.mxu0  ;;  %v1077_v25 = vpop.f32.mrf.mxu1 }
 0x112   : > { %v1404_v26 = vadd.f32 %v2767_v18, %v949_v24  ;;  %v1436_v27 = vadd.f32 %v2767_v18, %v1077_v25 }
 0x113   : > { %v951_v28 = vpop.f32.mrf.mxu0  ;;  %v1079_v29 = vpop.f32.mrf.mxu1 }
 0x114   : > { %v1468_v32 = vmax.f32 %v1404_v26, 0.0  ;;  %v1500_v33 = vmax.f32 %v1436_v27, 0.0 }
 0x115   : > { %v954_v34 = vpop.f32.mrf.mxu0  ;;  %v1082_v35 = vpop.f32.mrf.mxu1 }
 0x116   : > { %v2192_v36 = vpack.c.bf16 %v1468_v32, %v1467_v30  ;;  %v2272_v37 = vpack.c.bf16 %v1500_v33, %v1499_v31  ;;  %v1405_v40 = vadd.f32 %v2767_v18, %v954_v34  ;;  %v1437_v41 = vadd.f32 %v2767_v18, %v1082_v35 }
 0x117   : > { %v956_v38 = vpop.f32.mrf.mxu0  ;;  %v1084_v39 = vpop.f32.mrf.mxu1 }
 0x118   : > { %2193 = vst [vmem:[%s2777_s8] sm:$0xff] %v2192_v36   ;;  %2364 = vst [vmem:[%s2777_s8 + $0x80] sm:$0xff] %v2272_v37   ;;  %v1469_v48 = vmax.f32 %v1405_v40, 0.0  ;;  %v1501_v49 = vmax.f32 %v1437_v41, 0.0 }
 0x119   : > { %v957_v42 = vpop.f32.mrf.mxu0  ;;  %v1085_v43 = vpop.f32.mrf.mxu1 }
 0x11a   : > { %v1406_v44 = vadd.f32 %v2767_v18, %v957_v42  ;;  %v1438_v45 = vadd.f32 %v2767_v18, %v1085_v43 }
 0x11b   : > { %v959_v46 = vpop.f32.mrf.mxu0  ;;  %v1087_v47 = vpop.f32.mrf.mxu1 }
 0x11c   : > { %v1470_v50 = vmax.f32 %v1406_v44, 0.0  ;;  %v1502_v51 = vmax.f32 %v1438_v45, 0.0 }
 0x11d   : > { %v962_v52 = vpop.f32.mrf.mxu0  ;;  %v1090_v53 = vpop.f32.mrf.mxu1 }
 0x11e   : > { %v2197_v54 = vpack.c.bf16 %v1470_v50, %v1469_v48  ;;  %v2277_v55 = vpack.c.bf16 %v1502_v51, %v1501_v49  ;;  %v1407_v58 = vadd.f32 %v2767_v18, %v962_v52  ;;  %v1439_v59 = vadd.f32 %v2767_v18, %v1090_v53 }
 0x11f   : > { %v964_v56 = vpop.f32.mrf.mxu0  ;;  %v1092_v57 = vpop.f32.mrf.mxu1 }
 0x120   : > { %2349 = vst [vmem:[%s2777_s8 + $0x8] sm:$0xff] %v2197_v54   ;;  %2365 = vst [vmem:[%s2777_s8 + $0x88] sm:$0xff] %v2277_v55   ;;  %v1471_v2 = vmax.f32 %v1407_v58, 0.0  ;;  %v1503_v3 = vmax.f32 %v1439_v59, 0.0 }
 0x121   : > { %v965_v60 = vpop.f32.mrf.mxu0  ;;  %v1093_v61 = vpop.f32.mrf.mxu1 }
 0x122   : > { %v1408_v62 = vadd.f32 %v2767_v18, %v965_v60  ;;  %v1440_v63 = vadd.f32 %v2767_v18, %v1093_v61 }
 0x123   : > { %v967_v0 = vpop.f32.mrf.mxu0  ;;  %v1095_v1 = vpop.f32.mrf.mxu1 }
 0x124   : > { %v1472_v4 = vmax.f32 %v1408_v62, 0.0  ;;  %v1504_v5 = vmax.f32 %v1440_v63, 0.0 }
 0x125   : > { %v970_v6 = vpop.f32.mrf.mxu0  ;;  %v1098_v7 = vpop.f32.mrf.mxu1 }
 0x126   : > { %v2202_v8 = vpack.c.bf16 %v1472_v4, %v1471_v2  ;;  %v2282_v9 = vpack.c.bf16 %v1504_v5, %v1503_v3  ;;  %v1409_v12 = vadd.f32 %v2767_v18, %v970_v6  ;;  %v1441_v13 = vadd.f32 %v2767_v18, %v1098_v7 }
 0x127   : > { %v972_v10 = vpop.f32.mrf.mxu0  ;;  %v1100_v11 = vpop.f32.mrf.mxu1 }
 0x128   : > { %2350 = vst [vmem:[%s2777_s8 + $0x10] sm:$0xff] %v2202_v8   ;;  %2366 = vst [vmem:[%s2777_s8 + $0x90] sm:$0xff] %v2282_v9   ;;  %v1473_v21 = vmax.f32 %v1409_v12, 0.0  ;;  %v1505_v22 = vmax.f32 %v1441_v13, 0.0 }
 0x129   : > { %v973_v14 = vpop.f32.mrf.mxu0  ;;  %v1101_v15 = vpop.f32.mrf.mxu1 }
 0x12a   : > { %v1410_v16 = vadd.f32 %v2767_v18, %v973_v14  ;;  %v1442_v17 = vadd.f32 %v2767_v18, %v1101_v15 }
 0x12b   : > { %v975_v19 = vpop.f32.mrf.mxu0  ;;  %v1103_v20 = vpop.f32.mrf.mxu1 }
 0x12c   : > { %v1474_v23 = vmax.f32 %v1410_v16, 0.0  ;;  %v1506_v24 = vmax.f32 %v1442_v17, 0.0 }
 0x12d   : > { %v978_v25 = vpop.f32.mrf.mxu0  ;;  %v1106_v26 = vpop.f32.mrf.mxu1 }
 0x12e   : > { %v2207_v27 = vpack.c.bf16 %v1474_v23, %v1473_v21  ;;  %v2287_v28 = vpack.c.bf16 %v1506_v24, %v1505_v22  ;;  %v1411_v31 = vadd.f32 %v2767_v18, %v978_v25  ;;  %v1443_v32 = vadd.f32 %v2767_v18, %v1106_v26 }
 0x12f   : > { %v980_v29 = vpop.f32.mrf.mxu0  ;;  %v1108_v30 = vpop.f32.mrf.mxu1 }
 0x130   : > { %2351 = vst [vmem:[%s2777_s8 + $0x18] sm:$0xff] %v2207_v27   ;;  %2367 = vst [vmem:[%s2777_s8 + $0x98] sm:$0xff] %v2287_v28   ;;  %v1475_v39 = vmax.f32 %v1411_v31, 0.0  ;;  %v1507_v40 = vmax.f32 %v1443_v32, 0.0 }
 0x131   : > { %v981_v33 = vpop.f32.mrf.mxu0  ;;  %v1109_v34 = vpop.f32.mrf.mxu1 }
 0x132   : > { %v1412_v35 = vadd.f32 %v2767_v18, %v981_v33  ;;  %v1444_v36 = vadd.f32 %v2767_v18, %v1109_v34 }
 0x133   : > { %v983_v37 = vpop.f32.mrf.mxu0  ;;  %v1111_v38 = vpop.f32.mrf.mxu1 }
 0x134   : > { %v1476_v41 = vmax.f32 %v1412_v35, 0.0  ;;  %v1508_v42 = vmax.f32 %v1444_v36, 0.0 }
 0x135   : > { %v986_v43 = vpop.f32.mrf.mxu0  ;;  %v1114_v44 = vpop.f32.mrf.mxu1 }
 0x136   : > { %v2212_v45 = vpack.c.bf16 %v1476_v41, %v1475_v39  ;;  %v2292_v46 = vpack.c.bf16 %v1508_v42, %v1507_v40  ;;  %v1413_v49 = vadd.f32 %v2767_v18, %v986_v43  ;;  %v1445_v50 = vadd.f32 %v2767_v18, %v1114_v44 }
 0x137   : > { %v988_v47 = vpop.f32.mrf.mxu0  ;;  %v1116_v48 = vpop.f32.mrf.mxu1 }
 0x138   : > { %2352 = vst [vmem:[%s2777_s8 + $0x20] sm:$0xff] %v2212_v45   ;;  %2368 = vst [vmem:[%s2777_s8 + $0xa0] sm:$0xff] %v2292_v46   ;;  %v1477_v57 = vmax.f32 %v1413_v49, 0.0  ;;  %v1509_v58 = vmax.f32 %v1445_v50, 0.0 }
 0x139   : > { %v989_v51 = vpop.f32.mrf.mxu0  ;;  %v1117_v52 = vpop.f32.mrf.mxu1 }
 0x13a   : > { %v1414_v53 = vadd.f32 %v2767_v18, %v989_v51  ;;  %v1446_v54 = vadd.f32 %v2767_v18, %v1117_v52 }
 0x13b   : > { %v991_v55 = vpop.f32.mrf.mxu0  ;;  %v1119_v56 = vpop.f32.mrf.mxu1 }
 0x13c   : > { %v1478_v59 = vmax.f32 %v1414_v53, 0.0  ;;  %v1510_v60 = vmax.f32 %v1446_v54, 0.0 }
 0x13d   : > { %v994_v61 = vpop.f32.mrf.mxu0  ;;  %v1122_v62 = vpop.f32.mrf.mxu1 }
 0x13e   : > { %v2217_v63 = vpack.c.bf16 %v1478_v59, %v1477_v57  ;;  %v2297_v0 = vpack.c.bf16 %v1510_v60, %v1509_v58  ;;  %v1415_v3 = vadd.f32 %v2767_v18, %v994_v61  ;;  %v1447_v4 = vadd.f32 %v2767_v18, %v1122_v62 }
 0x13f   : > { %v996_v1 = vpop.f32.mrf.mxu0  ;;  %v1124_v2 = vpop.f32.mrf.mxu1 }
 0x140   : > { %2353 = vst [vmem:[%s2777_s8 + $0x28] sm:$0xff] %v2217_v63   ;;  %2369 = vst [vmem:[%s2777_s8 + $0xa8] sm:$0xff] %v2297_v0   ;;  %v1479_v11 = vmax.f32 %v1415_v3, 0.0  ;;  %v1511_v12 = vmax.f32 %v1447_v4, 0.0 }
 0x141   : > { %v997_v5 = vpop.f32.mrf.mxu0  ;;  %v1125_v6 = vpop.f32.mrf.mxu1 }
 0x142   : > { %v1416_v7 = vadd.f32 %v2767_v18, %v997_v5  ;;  %v1448_v8 = vadd.f32 %v2767_v18, %v1125_v6 }
 0x143   : > { %v999_v9 = vpop.f32.mrf.mxu0  ;;  %v1127_v10 = vpop.f32.mrf.mxu1 }
 0x144   : > { %v1480_v13 = vmax.f32 %v1416_v7, 0.0  ;;  %v1512_v14 = vmax.f32 %v1448_v8, 0.0 }
 0x145   : > { %v1002_v15 = vpop.f32.mrf.mxu0  ;;  %v1130_v16 = vpop.f32.mrf.mxu1 }
 0x146   : > { %v2222_v17 = vpack.c.bf16 %v1480_v13, %v1479_v11  ;;  %v2302_v19 = vpack.c.bf16 %v1512_v14, %v1511_v12  ;;  %v1417_v22 = vadd.f32 %v2767_v18, %v1002_v15  ;;  %v1449_v23 = vadd.f32 %v2767_v18, %v1130_v16 }
 0x147   : > { %v1004_v20 = vpop.f32.mrf.mxu0  ;;  %v1132_v21 = vpop.f32.mrf.mxu1 }
 0x148   : > { %2354 = vst [vmem:[%s2777_s8 + $0x30] sm:$0xff] %v2222_v17   ;;  %2370 = vst [vmem:[%s2777_s8 + $0xb0] sm:$0xff] %v2302_v19   ;;  %v1481_v30 = vmax.f32 %v1417_v22, 0.0  ;;  %v1513_v31 = vmax.f32 %v1449_v23, 0.0 }
 0x149   : > { %v1005_v24 = vpop.f32.mrf.mxu0  ;;  %v1133_v25 = vpop.f32.mrf.mxu1 }
 0x14a   : > { %v1418_v26 = vadd.f32 %v2767_v18, %v1005_v24  ;;  %v1450_v27 = vadd.f32 %v2767_v18, %v1133_v25 }
 0x14b   : > { %v1007_v28 = vpop.f32.mrf.mxu0  ;;  %v1135_v29 = vpop.f32.mrf.mxu1 }
 0x14c   : > { %v1482_v32 = vmax.f32 %v1418_v26, 0.0  ;;  %v1514_v33 = vmax.f32 %v1450_v27, 0.0 }
 0x14d   : > { %v1010_v34 = vpop.f32.mrf.mxu0  ;;  %v1138_v35 = vpop.f32.mrf.mxu1 }
 0x14e   : > { %v2227_v36 = vpack.c.bf16 %v1482_v32, %v1481_v30  ;;  %v2307_v37 = vpack.c.bf16 %v1514_v33, %v1513_v31  ;;  %v1419_v40 = vadd.f32 %v2767_v18, %v1010_v34  ;;  %v1451_v41 = vadd.f32 %v2767_v18, %v1138_v35 }
 0x14f   : > { %v1012_v38 = vpop.f32.mrf.mxu0  ;;  %v1140_v39 = vpop.f32.mrf.mxu1 }
 0x150   : > { %2355 = vst [vmem:[%s2777_s8 + $0x38] sm:$0xff] %v2227_v36   ;;  %2371 = vst [vmem:[%s2777_s8 + $0xb8] sm:$0xff] %v2307_v37   ;;  %v1483_v48 = vmax.f32 %v1419_v40, 0.0  ;;  %v1515_v49 = vmax.f32 %v1451_v41, 0.0 }
 0x151   : > { %v1013_v42 = vpop.f32.mrf.mxu0  ;;  %v1141_v43 = vpop.f32.mrf.mxu1 }
 0x152   : > { %v1420_v44 = vadd.f32 %v2767_v18, %v1013_v42  ;;  %v1452_v45 = vadd.f32 %v2767_v18, %v1141_v43 }
 0x153   : > { %v1015_v46 = vpop.f32.mrf.mxu0  ;;  %v1143_v47 = vpop.f32.mrf.mxu1 }
 0x154   : > { %v1484_v50 = vmax.f32 %v1420_v44, 0.0  ;;  %v1516_v51 = vmax.f32 %v1452_v45, 0.0 }
 0x155   : > { %v1018_v52 = vpop.f32.mrf.mxu0  ;;  %v1146_v53 = vpop.f32.mrf.mxu1 }
 0x156   : > { %v2232_v54 = vpack.c.bf16 %v1484_v50, %v1483_v48  ;;  %v2312_v55 = vpack.c.bf16 %v1516_v51, %v1515_v49  ;;  %v1421_v58 = vadd.f32 %v2767_v18, %v1018_v52  ;;  %v1453_v59 = vadd.f32 %v2767_v18, %v1146_v53 }
 0x157   : > { %v1020_v56 = vpop.f32.mrf.mxu0  ;;  %v1148_v57 = vpop.f32.mrf.mxu1 }
 0x158   : > { %2356 = vst [vmem:[%s2777_s8 + $0x40] sm:$0xff] %v2232_v54   ;;  %2372 = vst [vmem:[%s2777_s8 + $0xc0] sm:$0xff] %v2312_v55   ;;  %v1485_v2 = vmax.f32 %v1421_v58, 0.0  ;;  %v1517_v3 = vmax.f32 %v1453_v59, 0.0 }
 0x159   : > { %v1021_v60 = vpop.f32.mrf.mxu0  ;;  %v1149_v61 = vpop.f32.mrf.mxu1 }
 0x15a   : > { %v1422_v62 = vadd.f32 %v2767_v18, %v1021_v60  ;;  %v1454_v63 = vadd.f32 %v2767_v18, %v1149_v61 }
 0x15b   : > { %v1023_v0 = vpop.f32.mrf.mxu0  ;;  %v1151_v1 = vpop.f32.mrf.mxu1 }
 0x15c   : > { %v1486_v4 = vmax.f32 %v1422_v62, 0.0  ;;  %v1518_v5 = vmax.f32 %v1454_v63, 0.0 }
 0x15d   : > { %v1026_v6 = vpop.f32.mrf.mxu0  ;;  %v1154_v7 = vpop.f32.mrf.mxu1 }
 0x15e   : > { %v2237_v8 = vpack.c.bf16 %v1486_v4, %v1485_v2  ;;  %v2317_v9 = vpack.c.bf16 %v1518_v5, %v1517_v3  ;;  %v1423_v12 = vadd.f32 %v2767_v18, %v1026_v6  ;;  %v1455_v13 = vadd.f32 %v2767_v18, %v1154_v7 }
 0x15f   : > { %v1028_v10 = vpop.f32.mrf.mxu0  ;;  %v1156_v11 = vpop.f32.mrf.mxu1 }
 0x160   : > { %2357 = vst [vmem:[%s2777_s8 + $0x48] sm:$0xff] %v2237_v8   ;;  %2373 = vst [vmem:[%s2777_s8 + $0xc8] sm:$0xff] %v2317_v9   ;;  %v1487_v21 = vmax.f32 %v1423_v12, 0.0  ;;  %v1519_v22 = vmax.f32 %v1455_v13, 0.0 }
 0x161   : > { %v1029_v14 = vpop.f32.mrf.mxu0  ;;  %v1157_v15 = vpop.f32.mrf.mxu1 }
 0x162   : > { %v1424_v16 = vadd.f32 %v2767_v18, %v1029_v14  ;;  %v1456_v17 = vadd.f32 %v2767_v18, %v1157_v15 }
 0x163   : > { %v1031_v19 = vpop.f32.mrf.mxu0  ;;  %v1159_v20 = vpop.f32.mrf.mxu1 }
 0x164   : > { %v1488_v23 = vmax.f32 %v1424_v16, 0.0  ;;  %v1520_v24 = vmax.f32 %v1456_v17, 0.0 }
 0x165   : > { %v1034_v25 = vpop.f32.mrf.mxu0  ;;  %v1162_v26 = vpop.f32.mrf.mxu1 }
 0x166   : > { %v2242_v27 = vpack.c.bf16 %v1488_v23, %v1487_v21  ;;  %v2322_v28 = vpack.c.bf16 %v1520_v24, %v1519_v22  ;;  %v1425_v31 = vadd.f32 %v2767_v18, %v1034_v25  ;;  %v1457_v32 = vadd.f32 %v2767_v18, %v1162_v26 }
 0x167   : > { %v1036_v29 = vpop.f32.mrf.mxu0  ;;  %v1164_v30 = vpop.f32.mrf.mxu1 }
 0x168   : > { %2358 = vst [vmem:[%s2777_s8 + $0x50] sm:$0xff] %v2242_v27   ;;  %2374 = vst [vmem:[%s2777_s8 + $0xd0] sm:$0xff] %v2322_v28   ;;  %v1489_v39 = vmax.f32 %v1425_v31, 0.0  ;;  %v1521_v40 = vmax.f32 %v1457_v32, 0.0 }
 0x169   : > { %v1037_v33 = vpop.f32.mrf.mxu0  ;;  %v1165_v34 = vpop.f32.mrf.mxu1 }
 0x16a   : > { %v1426_v35 = vadd.f32 %v2767_v18, %v1037_v33  ;;  %v1458_v36 = vadd.f32 %v2767_v18, %v1165_v34 }
 0x16b   : > { %v1039_v37 = vpop.f32.mrf.mxu0  ;;  %v1167_v38 = vpop.f32.mrf.mxu1 }
 0x16c   : > { %v1490_v41 = vmax.f32 %v1426_v35, 0.0  ;;  %v1522_v42 = vmax.f32 %v1458_v36, 0.0 }
 0x16d   : > { %v1042_v43 = vpop.f32.mrf.mxu0  ;;  %v1170_v44 = vpop.f32.mrf.mxu1 }
 0x16e   : > { %v2247_v45 = vpack.c.bf16 %v1490_v41, %v1489_v39  ;;  %v2327_v46 = vpack.c.bf16 %v1522_v42, %v1521_v40  ;;  %v1427_v49 = vadd.f32 %v2767_v18, %v1042_v43  ;;  %v1459_v50 = vadd.f32 %v2767_v18, %v1170_v44 }
 0x16f   : > { %v1044_v47 = vpop.f32.mrf.mxu0  ;;  %v1172_v48 = vpop.f32.mrf.mxu1 }
 0x170   : > { %2359 = vst [vmem:[%s2777_s8 + $0x58] sm:$0xff] %v2247_v45   ;;  %2375 = vst [vmem:[%s2777_s8 + $0xd8] sm:$0xff] %v2327_v46   ;;  %v1491_v57 = vmax.f32 %v1427_v49, 0.0  ;;  %v1523_v58 = vmax.f32 %v1459_v50, 0.0 }
 0x171   : > { %v1045_v51 = vpop.f32.mrf.mxu0  ;;  %v1173_v52 = vpop.f32.mrf.mxu1 }
 0x172   : > { %v1428_v53 = vadd.f32 %v2767_v18, %v1045_v51  ;;  %v1460_v54 = vadd.f32 %v2767_v18, %v1173_v52 }
 0x173   : > { %v1047_v55 = vpop.f32.mrf.mxu0  ;;  %v1175_v56 = vpop.f32.mrf.mxu1 }
 0x174   : > { %v1492_v59 = vmax.f32 %v1428_v53, 0.0  ;;  %v1524_v60 = vmax.f32 %v1460_v54, 0.0 }
 0x175   : > { %v1050_v61 = vpop.f32.mrf.mxu0  ;;  %v1178_v62 = vpop.f32.mrf.mxu1 }
 0x176   : > { %v2252_v63 = vpack.c.bf16 %v1492_v59, %v1491_v57  ;;  %v2332_v0 = vpack.c.bf16 %v1524_v60, %v1523_v58  ;;  %v1429_v3 = vadd.f32 %v2767_v18, %v1050_v61  ;;  %v1461_v4 = vadd.f32 %v2767_v18, %v1178_v62 }
 0x177   : > { %v1052_v1 = vpop.f32.mrf.mxu0  ;;  %v1180_v2 = vpop.f32.mrf.mxu1 }
 0x178   : > { %2360 = vst [vmem:[%s2777_s8 + $0x60] sm:$0xff] %v2252_v63   ;;  %2376 = vst [vmem:[%s2777_s8 + $0xe0] sm:$0xff] %v2332_v0   ;;  %v1493_v11 = vmax.f32 %v1429_v3, 0.0  ;;  %v1525_v12 = vmax.f32 %v1461_v4, 0.0 }
 0x179   : > { %v1053_v5 = vpop.f32.mrf.mxu0  ;;  %v1181_v6 = vpop.f32.mrf.mxu1 }
 0x17a   : > { %v1430_v7 = vadd.f32 %v2767_v18, %v1053_v5  ;;  %v1462_v8 = vadd.f32 %v2767_v18, %v1181_v6 }
 0x17b   : > { %v1055_v9 = vpop.f32.mrf.mxu0  ;;  %v1183_v10 = vpop.f32.mrf.mxu1 }
 0x17c   : > { %v1494_v13 = vmax.f32 %v1430_v7, 0.0  ;;  %v1526_v14 = vmax.f32 %v1462_v8, 0.0 }
 0x17d   : > { %v1058_v15 = vpop.f32.mrf.mxu0  ;;  %v1186_v16 = vpop.f32.mrf.mxu1 }
 0x17e   : > { %v2257_v17 = vpack.c.bf16 %v1494_v13, %v1493_v11  ;;  %v2337_v19 = vpack.c.bf16 %v1526_v14, %v1525_v12  ;;  %v1431_v22 = vadd.f32 %v2767_v18, %v1058_v15  ;;  %v1463_v23 = vadd.f32 %v2767_v18, %v1186_v16 }
 0x17f   : > { %v1060_v20 = vpop.f32.mrf.mxu0  ;;  %v1188_v21 = vpop.f32.mrf.mxu1 }
 0x180   : > { %2361 = vst [vmem:[%s2777_s8 + $0x68] sm:$0xff] %v2257_v17   ;;  %2377 = vst [vmem:[%s2777_s8 + $0xe8] sm:$0xff] %v2337_v19   ;;  %v1495_v30 = vmax.f32 %v1431_v22, 0.0  ;;  %v1527_v31 = vmax.f32 %v1463_v23, 0.0 }
 0x181   : > { %v1061_v24 = vpop.f32.mrf.mxu0  ;;  %v1189_v25 = vpop.f32.mrf.mxu1 }
 0x182   : > { %v1432_v26 = vadd.f32 %v2767_v18, %v1061_v24  ;;  %v1464_v27 = vadd.f32 %v2767_v18, %v1189_v25 }
 0x183   : > { %v1063_v28 = vpop.f32.mrf.mxu0  ;;  %v1191_v29 = vpop.f32.mrf.mxu1 }
 0x184   : > { %v1496_v32 = vmax.f32 %v1432_v26, 0.0  ;;  %v1528_v33 = vmax.f32 %v1464_v27, 0.0 }
 0x185   : > { %v1066_v34 = vpop.f32.mrf.mxu0  ;;  %v1194_v35 = vpop.f32.mrf.mxu1 }
 0x186   : > { %v2262_v36 = vpack.c.bf16 %v1496_v32, %v1495_v30  ;;  %v2342_v37 = vpack.c.bf16 %v1528_v33, %v1527_v31  ;;  %v1433_v40 = vadd.f32 %v2767_v18, %v1066_v34  ;;  %v1465_v41 = vadd.f32 %v2767_v18, %v1194_v35 }
 0x187   : > { %v1068_v38 = vpop.f32.mrf.mxu0  ;;  %v1196_v39 = vpop.f32.mrf.mxu1 }
 0x188   : > { %2362 = vst [vmem:[%s2777_s8 + $0x70] sm:$0xff] %v2262_v36   ;;  %2378 = vst [vmem:[%s2777_s8 + $0xf0] sm:$0xff] %v2342_v37   ;;  %v1497_v48 = vmax.f32 %v1433_v40, 0.0  ;;  %v1529_v49 = vmax.f32 %v1465_v41, 0.0 }
 0x189   : > { %v1069_v42 = vpop.f32.mrf.mxu0  ;;  %v1197_v43 = vpop.f32.mrf.mxu1 }
 0x18a   : > { %v1434_v44 = vadd.f32 %v2767_v18, %v1069_v42  ;;  %v1466_v45 = vadd.f32 %v2767_v18, %v1197_v43 }
 0x18b   : > { %v1071_v46 = vpop.f32.mrf.mxu0  ;;  %v1199_v47 = vpop.f32.mrf.mxu1 }
 0x18c   : > { %v1498_v50 = vmax.f32 %v1434_v44, 0.0  ;;  %v1530_v51 = vmax.f32 %v1466_v45, 0.0 }
 0x18e   : > { %v2267_v52 = vpack.c.bf16 %v1498_v50, %v1497_v48  ;;  %v2347_v53 = vpack.c.bf16 %v1530_v51, %v1529_v49 }
 0x190   : > { %2363 = vst [vmem:[%s2777_s8 + $0x78] sm:$0xff] %v2267_v52   ;;  %2379 = vst [vmem:[%s2777_s8 + $0xf8] sm:$0xff] %v2347_v53  }
 0x191 PF: > { %s13_s14 = sadd.s32 1, %s2571_s14   ;;  %s2884_s12 = smov %s2567_s13 }
 0x192   : > { %p10_p5 = scmp.ge.s32.totalorder %s13_s14, 6   ;;  %s2885_s13 = smov %s2887_s15 }
 0x194   :  { %12 = sbr.rel (!%p10_p5) target bundleno = 2 (0x2), region = 76 }

// kernel: _stem_forward.3
= control target key start
LH: loop header
LB: loop body
LE: loop exit
PB: predicated region body
PF: predicated region fallthrough
CT: control target
= control target key end

     0   :  { %9 = vsyncpa [#allocation3], 0  ;;  %s2765_s0 = inlined_call_operand.vmem [shape: bf16[2,17,17,64], index: 0, kind: input, shape index: {}]   ;;  %s2766_s1 = inlined_call_operand.vmem [shape: bf16[2,17,16,64], index: 1, kind: input, shape index: {}]   ;;  %s2767_s2 = inlined_call_operand.vmem [shape: bf16[2,16,17,64], index: 2, kind: input, shape index: {}]   ;;  %s2768_s3 = inlined_call_operand.vmem [shape: bf16[2,16,16,64], index: 3, kind: input, shape index: {}]   ;;  %s2769_s4 = inlined_call_operand.hbm [shape: bf16[2,16,16,64], index: 4, kind: output, shape index: {}]  }
   0x1   :  { %11 = vsyncpa [#allocation3 + $0x1], 0  ;;  %s1834_s15 = smov 0   ;;  %s1836_s16 = smov 0  }
   0x2   :  { %s1838_s17 = smov 0   ;;  %s1840_s18 = smov 0  }
   0x3 LB: > { %s1855_s19 = sadd.s32 4294967295, %s1804_s18   ;;  %s1683_s20 = sadd.s32 4294967294, %s1804_s18   ;;  %s1804_s18 = sphi %s1840_s18, %s2777_s18   ;;  %s1800_s17 = sphi %s1838_s17, %s2776_s17   ;;  %s1796_s16 = sphi %s1836_s16, %s2775_s16   ;;  %s1792_s15 = sphi %s1834_s15, %s2774_s15  }
   0x4   : > { %s1859_s21 = sadd.s32 1, %s1804_s18   ;;  %s128_s22 = sadd.s32 1, %s1800_s17 }
   0x5   : > { %s125_s23 = ssub.s32 %s1804_s18, %s1859_s21  ;;  %p138_p0 = scmp.ne.s32.totalorder %s1800_s17, %s1796_s16 }
   0x6   : > { %p126_p1 = scmp.eq.s32.totalorder %s125_s23, 0  ;;  %p139_p2 = scmp.eq.s32.totalorder %s1855_s19, 1 }
   0x7   : > { %p144_p3 = scmp.ne.s32.totalorder %s1796_s16, %s1792_s15  ;;  %p145_p4 = scmp.eq.s32.totalorder %s1683_s20, 1 }
   0x8   : > { %s1870_s24 = scalar_select %p126_p1, %s1800_s17, %s128_s22  }
   0x9   : > { %p1872_p5 = por %p139_p2, %p138_p0  ;;  %p1876_p6 = por %p145_p4, %p144_p3 }
   0xa   : > { %p1686_p7 = scmp.ge.s32.totalorder %s1804_s18, 1  ;;  %p195_p8 = scmp.lt.s32.totalorder %s1804_s18, 3 }
   0xc   : > { %p196_p9 = pnand %p1686_p7, %p195_p8 }
   0xd   : > { %p236_p10 = scmp.lt.s32.totalorder (!%p196_p9), %s1855_s19, 1  ;;  %s1699_s30 = sshll.u32 (!%p196_p9), %s1855_s19, 11 }
   0xe   : > { %199 = sbr.rel (%p196_p9) target bundleno = 242 (0xf2), region = 36  ;;  %s2717_s8 = scalar_lea.hbm (!%p196_p9), %s2769_s4, %s1699_s30 }
  0x13   : > { %s1884_s27 = scalar_select %p236_p10, %s1855_s19, 1  ;;  %vm453_vm0 = vsmask.f32 3328  ;;  %vm454_vm1 = vsmask.f32 7440  ;;  %vm1538_vm3 = vcmask 519168  }
  0x14   : > { %vm1948_vm2 = vmor %vm453_vm0, %vm454_vm1 }
  0x15   : > { %s1700_s28 = smul.u32 204, %s1884_s27  ;;  %s1698_s14 = sshll.u32 %s1884_s27, 7 }
  0x16   : > { %s1701_s29 = smul.u32 136, %s1884_s27  ;;  %s1962_s23 = scalar_lea.vmem %s2768_s3, %s1698_s14 }
  0x17   : > { %s1891_s6 = scalar_lea.vmem %s2765_s0, %s1700_s28  ;;  %s1702_s7 = smul.u32 192, %s1884_s27  ;;  %v389_v58 = vld [vmem:[%s1962_s23] sm:$0xf]  ;;  %v391_v63 = vld [vmem:[%s1962_s23 + $0x8] sm:$0xf] }
  0x18   : > { %s1897_s10 = scalar_lea.vmem %s2766_s1, %s1701_s29  ;;  %v256_v0 = vld [vmem:[%s1891_s6] sm:$0xf]  ;;  %v1901_v1 = vld [vmem:[%s1891_s6 + $0x4] sm:$0xf]  ;;  %v1904_v2 = vld [vmem:[%s1891_s6 + $0xc] sm:$0xf] }
  0x19   : > { %s1909_s13 = scalar_lea.vmem %s2767_s2, %s1702_s7  ;;  %v1912_v3 = vld [vmem:[%s1891_s6 + $0x10] sm:$0xf]  ;;  %v307_v4 = vld [vmem:[%s1897_s10] sm:$0xf]  ;;  %v1916_v5 = vld [vmem:[%s1897_s10 + $0x8] sm:$0xf] }
  0x1a   : > { %v1919_v6 = vld [vmem:[%s1909_s13] sm:$0xf]  ;;  %v421_v7 = vmax.bf16 %v307_v4, %v256_v0  ;;  %v423_v8 = vmax.bf16 %v1916_v5, %v1904_v2  ;;  %v1924_v9 = vld [vmem:[%s1909_s13 + $0x4] sm:$0xf]  ;;  %v457_v10 = vshrl.u32 %v256_v0, 16  ;;  %v460_v11 = vshll.u32 %v256_v0, 16 }
  0x1b   : > { %v466_v12 = vshll.u32 %v1901_v1, 16  ;;  %v481_v13 = vshrl.u32 %v1904_v2, 16  ;;  %v1929_v14 = vld [vmem:[%s1909_s13 + $0xc] sm:$0xf]  ;;  %v484_v15 = vshll.u32 %v1904_v2, 16  ;;  %v490_v16 = vshll.u32 %v1912_v3, 16 }
  0x1c   : > { %v969_v17 = vshrl.u32 %v1919_v6, 16  ;;  %v972_v18 = vshll.u32 %v1919_v6, 16  ;;  %v459_v19 = vrot.slane %v457_v10, 4  ;;  %v462_v20 = vrot.slane %v460_v11, 5  ;;  %v1936_v23 = vld [vmem:[%s1897_s10 + $0x4] sm:$0xf] }
  0x1d   : > { %v468_v21 = vrot.slane %v466_v12, 5  ;;  %v483_v22 = vrot.slane %v481_v13, 4  ;;  %v486_v24 = vrot.slane %v484_v15, 5  ;;  %v492_v25 = vrot.slane %v490_v16, 5  ;;  %v1939_v28 = vld [vmem:[%s1897_s10 + $0xc] sm:$0xf] }
  0x1e   : > { %v971_v26 = vrot.slane %v969_v17, 4  ;;  %v974_v27 = vrot.slane %v972_v18, 5  ;;  %v463_v29 = vor.u32 %v462_v20, %v459_v19  ;;  %v978_v30 = vshll.u32 %v1924_v9, 16  ;;  %v258_v33 = vld [vmem:[%s1891_s6 + $0x8] sm:$0x1]  ;;  %s233_s27 = sand.u32 1, %s1796_s16  }
  0x1f   : > { %v993_v31 = vshrl.u32 %v1929_v14, 16  ;;  %v996_v32 = vshll.u32 %v1929_v14, 16  ;;  %v487_v35 = vor.u32 %v486_v24, %v483_v22  ;;  %v261_v37 = vld [vmem:[%s1891_s6 + $0x14] sm:$0x1]  ;;  %v422_v38 = vmax.bf16 %v1936_v23, %v1901_v1  ;;  %v343_v50 = vld [vmem:[%s1909_s13 + $0x8] sm:$0x1] }
  0x20   : > { %v975_v36 = vor.u32 %v974_v27, %v971_v26  ;;  %v424_v39 = vmax.bf16 %v1939_v28, %v1912_v3  ;;  %v464_v40 = vrot.slane %v463_v29, 4  ;;  %v980_v41 = vrot.slane %v978_v30, 5  ;;  %v345_v56 = vld [vmem:[%s1909_s13 + $0x10] sm:$0xf]  ;;  %s1999_s28 = sshll.u32 %s233_s27, 7  ;;  %s2725_s19 = scalar_lea.sflag [#allocation3], %s233_s27 }
  0x21   : > { %v1957_v42 = vrot.slane %v993_v31, 4  ;;  %v998_v43 = vrot.slane %v996_v32, 5  ;;  %v488_v44 = vrot.slane %v487_v35, 4  ;;  %v470_v46 = vshrl.u32 %v1901_v1, 16  ;;  %v1984_v15 = vld [vmem:[%s1897_s10 + $0x10] sm:$0xf] }
  0x22   : > { %v976_v45 = vrot.slane %v975_v36, 4  ;;  %v476_v47 = vshll.u32 %v258_v33, 16  ;;  %v469_v48 = vsel %vm1948_vm2, %v464_v40, %v468_v21  ;;  %v494_v51 = vshrl.u32 %v1912_v3, 16  ;;  %v390_v33 = vld [vmem:[%s1962_s23 + $0x4] sm:$0xf]  ;;  %s2032_s29 = scalar_lea.vmem [#allocation2], %s1999_s28 }
  0x23   : > { %v999_v49 = vor.u32 %v998_v43, %v1957_v42  ;;  %v500_v52 = vshll.u32 %v261_v37, 16  ;;  %v1972_v53 = vsel %vm1948_vm2, %v488_v44, %v492_v25  ;;  %v872_v54 = vmax.bf16 %v469_v48, %v421_v7  ;;  %v2010_v37 = vld [vmem:[%s1909_s13 + $0x18] sm:$0xf]  ;;  %s1585_s5 = sshll.u32 %s2032_s29, 4  ;;  %s2719_s5 = int_to_ptr.vmem [resolvable:$true] %s1585_s5 }
  0x24   : > { %v981_v55 = vsel %vm1948_vm2, %v976_v45, %v980_v41  ;;  %v472_v57 = vrot.slane %v470_v46, 4  ;;  %v874_v59 = vmax.bf16 %v1972_v53, %v423_v8  ;;  %v478_v60 = vrot.slane %v476_v47, 5  ;;  %v2020_v47 = vld [vmem:[%s1897_s10 + $0x14] sm:$0xf]  ;;  %s1744_s9 = scalar_lea.vmem %s2719_s5, 2048 }
  0x25   : > { %v496_v61 = vrot.slane %v494_v51, 4  ;;  %v502_v62 = vrot.slane %v500_v52, 5  ;;  %v904_v0 = vmax.bf16 %v872_v54, %v1919_v6  ;;  %v982_v4 = vshrl.u32 %v1924_v9, 16  ;;  %v1988_v6 = vld [vmem:[%s1891_s6 + $0x18] sm:$0xf]  ;;  %p1745_p11 = scmp.ne.s32.totalorder %s2719_s5, %s1744_s9 }
  0x26   : > { %v473_v1 = vor.u32 %v472_v57, %v468_v21  ;;  %v988_v7 = vshll.u32 %v343_v50, 16  ;;  %v906_v10 = vmax.bf16 %v874_v59, %v1929_v14  ;;  %v1002_v12 = vshll.u32 %v345_v56, 16  ;;  %v264_v52 = vld [vmem:[%s1891_s6 + $0x20] sm:$0x1] }
  0x27   : > { %v497_v11 = vor.u32 %v496_v61, %v492_v25  ;;  %v1006_v13 = vshrl.u32 %v345_v56, 16  ;;  %v936_v8 = vmax.bf16 %v904_v0, %v389_v58  ;;  %v984_v17 = vrot.slane %v982_v4, 4  ;;  %v1993_v25 = vld [vmem:[%s1891_s6 + $0x1c] sm:$0xf]  ;;  %p1746_p12 = pnand %p1745_p11, %p1872_p5 }
  0x28   : > { %v474_v16 = vrot.slane %v473_v1, 4  ;;  %v990_v18 = vrot.slane %v988_v7, 5  ;;  %v938_v19 = vmax.bf16 %v906_v10, %v391_v63  ;;  %v1004_v21 = vrot.slane %v1002_v12, 5  ;;  %v348_v4 = vld [vmem:[%s1909_s13 + $0x1c] sm:$0xf] }
  0x29   : > { %v498_v20 = vrot.slane %v497_v11, 4  ;;  %v1008_v14 = vrot.slane %v1006_v13, 4  ;;  %v1384_v22 = vmax.bf16 %v981_v55, %v936_v8  ;;  %v985_v24 = vor.u32 %v984_v17, %v980_v41  ;;  %v392_v41 = vld [vmem:[%s1962_s23 + $0xc] sm:$0xf]  ;;  %v2041_v11 = vld [vmem:[%s1897_s10 + $0x18] sm:$0xf]  ;;  %p1747_p13 = pneg %p1746_p12 }
  0x2a   : > { %v479_v23 = vsel %vm1948_vm2, %v474_v16, %v478_v60  ;;  %v425_v26 = vmax.bf16 %v1984_v15, %v1988_v6  ;;  %v505_v31 = vshrl.u32 %v1988_v6, 16  ;;  %v508_v40 = vshll.u32 %v1988_v6, 16 }
  0x2b   : > { %v2003_v27 = vsel %vm1948_vm2, %v498_v20, %v502_v62  ;;  %v873_v29 = vmax.bf16 %v479_v23, %v422_v38  ;;  %v1009_v30 = vor.u32 %v1008_v14, %v1004_v21  ;;  %v1416_v32 = vmax.bf16 %v1384_v22, %v1904_v2  ;;  %v393_v20 = vld [vmem:[%s1962_s23 + $0x10] sm:$0xf]  ;;  %v2052_v23 = vld [vmem:[%s1891_s6 + $0x28] sm:$0xf] }
  0x2c   : > { %v875_v35 = vmax.bf16 %v2003_v27, %v424_v39  ;;  %v986_v36 = vrot.slane %v985_v24, 4  ;;  %v507_v43 = vrot.slane %v505_v31, 4  ;;  %v514_v38 = vshll.u32 %v1993_v25, 16 }
  0x2d   : > { %v905_v42 = vmax.bf16 %v873_v29, %v1924_v9  ;;  %v1000_v44 = vrot.slane %v999_v49, 4  ;;  %v1448_v45 = vmax.bf16 %v1416_v32, %v1916_v5  ;;  %v510_v46 = vrot.slane %v508_v40, 5 }
  0x2e   : > { %v907_v2 = vmax.bf16 %v875_v35, %v345_v56  ;;  %v991_v39 = vsel %vm1948_vm2, %v986_v36, %v990_v18  ;;  %v516_v50 = vrot.slane %v514_v38, 5  ;;  %v1017_v51 = vshrl.u32 %v2010_v37, 16  ;;  %v346_v56 = vld [vmem:[%s1909_s13 + $0x14] sm:$0x1]  ;;  %v2065_v36 = vld [vmem:[%s1909_s13 + $0x24] sm:$0xf] }
  0x2f   : > { %v937_v48 = vmax.bf16 %v905_v42, %v390_v33  ;;  %v1005_v9 = vsel %vm1948_vm2, %v1000_v44, %v1004_v21  ;;  %v1506_v49 = vmax.bf16 %v1448_v45, %v1972_v53  ;;  %v511_v5 = vor.u32 %v510_v46, %v507_v43  ;;  %v2074_v44 = vld [vmem:[%s1897_s10 + $0x1c] sm:$0xf] }
  0x30   : > { %v939_v54 = vmax.bf16 %v907_v2, %v392_v41  ;;  %v1020_v55 = vshll.u32 %v2010_v37, 16  ;;  %v1019_v58 = vrot.slane %v1017_v51, 4  ;;  %v1386_v59 = vmax.bf16 %v1005_v9, %v938_v19 }
  0x31   : > { %v1385_v57 = vmax.bf16 %v991_v39, %v937_v48  ;;  %v426_v60 = vmax.bf16 %v2020_v47, %v1993_v25  ;;  %1539 = vst.msk [vmem:[%s2032_s29] sm:$0xf] %vm1538_vm3, %v1506_v49  ;;  %v512_v61 = vrot.slane %v511_v5, 4  ;;  %v518_v62 = vshrl.u32 %v1993_v25, 16  ;;  %v394_v48 = vld [vmem:[%s1962_s23 + $0x14] sm:$0xf] }
  0x32   : > { %v1022_v53 = vrot.slane %v1020_v55, 5  ;;  %v524_v63 = vshll.u32 %v264_v52, 16  ;;  %v1418_v1 = vmax.bf16 %v1386_v59, %v1988_v6  ;;  %v1010_v7 = vrot.slane %v1009_v30, 4  ;;  %v2048_v6 = vld [vmem:[%s1891_s6 + $0x24] sm:$0xf] }
  0x33   : > { %v1417_v0 = vmax.bf16 %v1385_v57, %v1912_v3  ;;  %v1012_v10 = vshll.u32 %v346_v56, 16  ;;  %v517_v12 = vsel %vm1948_vm2, %v512_v61, %v516_v50  ;;  %v520_v8 = vrot.slane %v518_v62, 4  ;;  %v349_v55 = vld [vmem:[%s1909_s13 + $0x20] sm:$0x1]  ;;  %v2087_v59 = vld [vmem:[%s1909_s13 + $0x28] sm:$0xf] }
  0x34   : > { %v1023_v13 = vor.u32 %v1022_v53, %v1019_v58  ;;  %v526_v16 = vrot.slane %v524_v63, 5  ;;  %v876_v18 = vmax.bf16 %v517_v12, %v425_v26  ;;  %v1450_v19 = vmax.bf16 %v1418_v1, %v1984_v15 }
  0x35   : > { %v1449_v17 = vmax.bf16 %v1417_v0, %v1939_v28  ;;  %v1014_v3 = vrot.slane %v1012_v10, 5  ;;  %v521_v21 = vor.u32 %v520_v8, %v516_v50  ;;  %v1026_v14 = vshll.u32 %v348_v4, 16  ;;  %v2092_v0 = vld [vmem:[%s1891_s6 + $0x30] sm:$0xf] }
  0x36   : > { %v1030_v22 = vshrl.u32 %v348_v4, 16  ;;  %v427_v24 = vmax.bf16 %v2041_v11, %v2048_v6  ;;  %v908_v26 = vmax.bf16 %v876_v18, %v2010_v37  ;;  %v1508_v15 = vmax.bf16 %v1450_v19, %v517_v12  ;;  %v2097_v12 = vld [vmem:[%s1897_s10 + $0x20] sm:$0xf] }
  0x37   : > { %v1507_v28 = vmax.bf16 %v1449_v17, %v2003_v27  ;;  %v1015_v29 = vsel %vm1948_vm2, %v1010_v7, %v1014_v3  ;;  %v522_v30 = vrot.slane %v521_v21, 4  ;;  %v1028_v31 = vrot.slane %v1026_v14, 5  ;;  %v395_v21 = vld [vmem:[%s1962_s23 + $0x18] sm:$0xf] }
  0x38   : > { %v1032_v32 = vrot.slane %v1030_v22, 4  ;;  %v1387_v33 = vmax.bf16 %v1015_v29, %v939_v54  ;;  %v940_v35 = vmax.bf16 %v908_v26, %v393_v20  ;;  %1541 = vst.msk [vmem:[%s2032_s29 + $0x8] sm:$0xf] %vm1538_vm3, %v1508_v15  ;;  %v529_v27 = vshrl.u32 %v2048_v6, 16  ;;  %v2105_v20 = vld [vmem:[%s1891_s6 + $0x34] sm:$0xf] }
  0x39   : > { %1540 = vst.msk [vmem:[%s2032_s29 + $0x4] sm:$0xf] %vm1538_vm3, %v1507_v28  ;;  %v532_v37 = vshll.u32 %v2048_v6, 16  ;;  %v538_v40 = vshll.u32 %v2052_v23, 16  ;;  %v527_v41 = vsel %vm1948_vm2, %v522_v30, %v526_v16  ;;  %v1024_v38 = vrot.slane %v1023_v13, 4 }
  0x3a   : > { %v1033_v42 = vor.u32 %v1032_v32, %v1028_v31  ;;  %v1419_v43 = vmax.bf16 %v1387_v33, %v1993_v25  ;;  %v877_v45 = vmax.bf16 %v527_v41, %v426_v60  ;;  %v531_v2 = vrot.slane %v529_v27, 4  ;;  %v267_v25 = vld [vmem:[%s1891_s6 + $0x2c] sm:$0x1]  ;;  %v2115_v30 = vld [vmem:[%s1909_s13 + $0x30] sm:$0xf] }
  0x3b   : > { %v534_v39 = vrot.slane %v532_v37, 5  ;;  %v540_v46 = vrot.slane %v538_v40, 5  ;;  %v1029_v9 = vsel %vm1948_vm2, %v1024_v38, %v1028_v31  ;;  %v1041_v51 = vshrl.u32 %v2065_v36, 16  ;;  %v2122_v27 = vld [vmem:[%s1897_s10 + $0x24] sm:$0xf] }
  0x3c   : > { %v1451_v50 = vmax.bf16 %v1419_v43, %v2020_v47  ;;  %v1044_v52 = vshll.u32 %v2065_v36, 16  ;;  %v909_v49 = vmax.bf16 %v877_v45, %v348_v4  ;;  %v1388_v5 = vmax.bf16 %v1029_v9, %v940_v35 }
  0x3d   : > { %v535_v54 = vor.u32 %v534_v39, %v531_v2  ;;  %v428_v56 = vmax.bf16 %v2074_v44, %v2052_v23  ;;  %v1043_v47 = vrot.slane %v1041_v51, 4  ;;  %v542_v60 = vshrl.u32 %v2052_v23, 16  ;;  %v270_v2 = vld [vmem:[%s1891_s6 + $0x38] sm:$0x1]  ;;  %v396_v39 = vld [vmem:[%s1962_s23 + $0x1c] sm:$0xf] }
  0x3e   : > { %v1509_v57 = vmax.bf16 %v1451_v50, %v527_v41  ;;  %v1046_v58 = vrot.slane %v1044_v52, 5  ;;  %v941_v61 = vmax.bf16 %v909_v49, %v394_v48  ;;  %v1420_v62 = vmax.bf16 %v1388_v5, %v2048_v6  ;;  %v352_v49 = vld [vmem:[%s1909_s13 + $0x2c] sm:$0x1] }
  0x3f   : > { %v536_v53 = vrot.slane %v535_v54, 4  ;;  %v548_v63 = vshll.u32 %v267_v25, 16  ;;  %v544_v4 = vrot.slane %v542_v60, 4  ;;  %v1034_v7 = vrot.slane %v1033_v42, 4 }
  0x40   : > { %1542 = vst.msk [vmem:[%s2032_s29 + $0xc] sm:$0xf] %vm1538_vm3, %v1509_v57  ;;  %v1047_v1 = vor.u32 %v1046_v58, %v1043_v47  ;;  %v1036_v10 = vshll.u32 %v349_v55, 16  ;;  %v1452_v8 = vmax.bf16 %v1420_v62, %v2041_v11  ;;  %v1050_v17 = vshll.u32 %v2087_v59, 16  ;;  %v2139_v55 = vld [vmem:[%s1909_s13 + $0x34] sm:$0xf] }
  0x41   : > { %v541_v13 = vsel %vm1948_vm2, %v536_v53, %v540_v46  ;;  %v550_v16 = vrot.slane %v548_v63, 5  ;;  %v545_v19 = vor.u32 %v544_v4, %v540_v46  ;;  %v1054_v6 = vshrl.u32 %v2087_v59, 16 }
  0x42   : > { %v878_v18 = vmax.bf16 %v541_v13, %v427_v24  ;;  %v1038_v3 = vrot.slane %v1036_v10, 5  ;;  %v1510_v14 = vmax.bf16 %v1452_v8, %v541_v13  ;;  %v1052_v22 = vrot.slane %v1050_v17, 5  ;;  %v2157_v17 = vld [vmem:[%s1891_s6 + $0x40] sm:$0xf] }
  0x43   : > { %v429_v28 = vmax.bf16 %v2097_v12, %v2092_v0  ;;  %v553_v11 = vshrl.u32 %v2092_v0, 16  ;;  %v546_v15 = vrot.slane %v545_v19, 4  ;;  %v1056_v29 = vrot.slane %v1054_v6, 4  ;;  %v397_v19 = vld [vmem:[%s1962_s23 + $0x20] sm:$0xf] }
  0x44   : > { %v910_v26 = vmax.bf16 %v878_v18, %v2065_v36  ;;  %v1039_v24 = vsel %vm1948_vm2, %v1034_v7, %v1038_v3  ;;  %1543 = vst.msk [vmem:[%s2032_s29 + $0x10] sm:$0xf] %vm1538_vm3, %v1510_v14  ;;  %v556_v33 = vshll.u32 %v2092_v0, 16  ;;  %v562_v35 = vshll.u32 %v2105_v20, 16 }
  0x45   : > { %v1389_v31 = vmax.bf16 %v1039_v24, %v941_v61  ;;  %v555_v32 = vrot.slane %v553_v11, 4  ;;  %v551_v37 = vsel %vm1948_vm2, %v546_v15, %v550_v16  ;;  %v1057_v40 = vor.u32 %v1056_v29, %v1052_v22  ;;  %v2144_v61 = vld [vmem:[%s1897_s10 + $0x28] sm:$0xf]  ;;  %v2170_v15 = vld [vmem:[%s1909_s13 + $0x3c] sm:$0xf] }
  0x46   : > { %v942_v36 = vmax.bf16 %v910_v26, %v395_v21  ;;  %v1048_v41 = vrot.slane %v1047_v1, 4  ;;  %v879_v42 = vmax.bf16 %v551_v37, %v428_v56  ;;  %v558_v38 = vrot.slane %v556_v33, 5  ;;  %v2147_v1 = vld [vmem:[%s1891_s6 + $0x3c] sm:$0xf] }
  0x47   : > { %v1421_v43 = vmax.bf16 %v1389_v31, %v2052_v23  ;;  %v564_v45 = vrot.slane %v562_v35, 5  ;;  %v1065_v48 = vshrl.u32 %v2115_v30, 16  ;;  %v1068_v50 = vshll.u32 %v2115_v30, 16 }
  0x48   : > { %v1053_v46 = vsel %vm1948_vm2, %v1048_v41, %v1052_v22  ;;  %v430_v9 = vmax.bf16 %v2122_v27, %v2105_v20  ;;  %v911_v51 = vmax.bf16 %v879_v42, %v2087_v59  ;;  %v559_v52 = vor.u32 %v558_v38, %v555_v32 }
  0x49   : > { %v1453_v23 = vmax.bf16 %v1421_v43, %v2074_v44  ;;  %v1390_v25 = vmax.bf16 %v1053_v46, %v942_v36  ;;  %v1067_v54 = vrot.slane %v1065_v48, 4  ;;  %v1070_v5 = vrot.slane %v1068_v50, 5  ;;  %v2176_v36 = vld [vmem:[%s1897_s10 + $0x2c] sm:$0xf]  ;;  %v398_v43 = vld [vmem:[%s1962_s23 + $0x24] sm:$0xf] }
  0x4a   : > { %v566_v56 = vshrl.u32 %v2105_v20, 16  ;;  %v572_v57 = vshll.u32 %v270_v2, 16  ;;  %v943_v47 = vmax.bf16 %v911_v51, %v396_v39  ;;  %v560_v60 = vrot.slane %v559_v52, 4  ;;  %v273_v46 = vld [vmem:[%s1891_s6 + $0x44] sm:$0x1] }
  0x4b   : > { %v1511_v58 = vmax.bf16 %v1453_v23, %v551_v37  ;;  %v1422_v59 = vmax.bf16 %v1390_v25, %v2092_v0  ;;  %v1071_v44 = vor.u32 %v1070_v5, %v1067_v54  ;;  %v1058_v63 = vrot.slane %v1057_v40, 4 }
  0x4c   : > { %v568_v53 = vrot.slane %v566_v56, 4  ;;  %v574_v62 = vrot.slane %v572_v57, 5  ;;  %v565_v4 = vsel %vm1948_vm2, %v560_v60, %v564_v45  ;;  %v1060_v10 = vshll.u32 %v352_v49, 16  ;;  %v355_v49 = vld [vmem:[%s1909_s13 + $0x38] sm:$0x1] }
  0x4d   : > { %1544 = vst.msk [vmem:[%s2032_s29 + $0x14] sm:$0xf] %vm1538_vm3, %v1511_v58  ;;  %v1454_v7 = vmax.bf16 %v1422_v59, %v2097_v12  ;;  %v1074_v0 = vshll.u32 %v2139_v55, 16  ;;  %v880_v13 = vmax.bf16 %v565_v4, %v429_v28  ;;  %v1078_v16 = vshrl.u32 %v2139_v55, 16  ;;  %v357_v56 = vld [vmem:[%s1909_s13 + $0x40] sm:$0xf] }
  0x4e   : > { %v569_v8 = vor.u32 %v568_v53, %v564_v45  ;;  %v431_v18 = vmax.bf16 %v2144_v61, %v2147_v1  ;;  %v1062_v6 = vrot.slane %v1060_v10, 5  ;;  %v577_v12 = vshrl.u32 %v2147_v1, 16 }
  0x4f   : > { %v1512_v3 = vmax.bf16 %v1454_v7, %v565_v4  ;;  %v1076_v21 = vrot.slane %v1074_v0, 5  ;;  %v912_v14 = vmax.bf16 %v880_v13, %v2115_v30  ;;  %v1080_v28 = vrot.slane %v1078_v16, 4  ;;  %v399_v13 = vld [vmem:[%s1962_s23 + $0x28] sm:$0xf] }
  0x50   : > { %v570_v22 = vrot.slane %v569_v8, 4  ;;  %v580_v11 = vshll.u32 %v2147_v1, 16  ;;  %v1063_v26 = vsel %vm1948_vm2, %v1058_v63, %v1062_v6  ;;  %v579_v24 = vrot.slane %v577_v12, 4  ;;  %v2215_v12 = vld [vmem:[%s1909_s13 + $0x48] sm:$0xf] }
  0x51   : > { %1545 = vst.msk [vmem:[%s2032_s29 + $0x18] sm:$0xf] %vm1538_vm3, %v1512_v3  ;;  %v586_v29 = vshll.u32 %v2157_v17, 16  ;;  %v1072_v31 = vrot.slane %v1071_v44, 4  ;;  %v944_v32 = vmax.bf16 %v912_v14, %v397_v19  ;;  %v1081_v33 = vor.u32 %v1080_v28, %v1076_v21  ;;  %v2195_v44 = vld [vmem:[%s1891_s6 + $0x48] sm:$0xf] }
  0x52   : > { %v575_v30 = vsel %vm1948_vm2, %v570_v22, %v574_v62  ;;  %v1391_v35 = vmax.bf16 %v1063_v26, %v943_v47  ;;  %v582_v40 = vrot.slane %v580_v11, 5  ;;  %v1089_v45 = vshrl.u32 %v2170_v15, 16 }
  0x53   : > { %v881_v37 = vmax.bf16 %v575_v30, %v430_v9  ;;  %v588_v41 = vrot.slane %v586_v29, 5  ;;  %v1077_v42 = vsel %vm1948_vm2, %v1072_v31, %v1076_v21  ;;  %v1092_v2 = vshll.u32 %v2170_v15, 16 }
  0x54   : > { %v1423_v38 = vmax.bf16 %v1391_v35, %v2105_v20  ;;  %v1392_v39 = vmax.bf16 %v1077_v42, %v944_v32  ;;  %v583_v50 = vor.u32 %v582_v40, %v579_v24  ;;  %v432_v9 = vmax.bf16 %v2176_v36, %v2157_v17  ;;  %v2224_v24 = vld [vmem:[%s1897_s10 + $0x34] sm:$0xf] }
  0x55   : > { %v913_v48 = vmax.bf16 %v881_v37, %v2139_v55  ;;  %v590_v51 = vshrl.u32 %v2157_v17, 16  ;;  %v1091_v20 = vrot.slane %v1089_v45, 4  ;;  %v1094_v52 = vrot.slane %v1092_v2, 5 }
  0x56   : > { %v1455_v23 = vmax.bf16 %v1423_v38, %v2122_v27  ;;  %v1424_v25 = vmax.bf16 %v1392_v39, %v2147_v1  ;;  %v584_v5 = vrot.slane %v583_v50, 4  ;;  %v596_v57 = vshll.u32 %v273_v46, 16  ;;  %v2198_v27 = vld [vmem:[%s1897_s10 + $0x30] sm:$0xf] }
  0x57   : > { %v945_v54 = vmax.bf16 %v913_v48, %v398_v43  ;;  %v592_v55 = vrot.slane %v590_v51, 4  ;;  %v1095_v58 = vor.u32 %v1094_v52, %v1091_v20  ;;  %v1082_v59 = vrot.slane %v1081_v33, 4  ;;  %v276_v38 = vld [vmem:[%s1891_s6 + $0x50] sm:$0x1]  ;;  %v358_v48 = vld [vmem:[%s1909_s13 + $0x44] sm:$0x1] }
  0x58   : > { %v1513_v47 = vmax.bf16 %v1455_v23, %v575_v30  ;;  %v1456_v60 = vmax.bf16 %v1424_v25, %v2144_v61  ;;  %v589_v53 = vsel %vm1948_vm2, %v584_v5, %v588_v41  ;;  %v598_v63 = vrot.slane %v596_v57, 5  ;;  %v2205_v61 = vld [vmem:[%s1891_s6 + $0x4c] sm:$0xf] }
  0x59   : > { %v593_v62 = vor.u32 %v592_v55, %v588_v41  ;;  %v1084_v1 = vshll.u32 %v355_v49, 16  ;;  %v882_v4 = vmax.bf16 %v589_v53, %v431_v18  ;;  %v1098_v10 = vshll.u32 %v357_v56, 16  ;;  %v400_v30 = vld [vmem:[%s1962_s23 + $0x2c] sm:$0xf] }
  0x5a   : > { %1546 = vst.msk [vmem:[%s2032_s29 + $0x1c] sm:$0xf] %vm1538_vm3, %v1513_v47  ;;  %v1514_v7 = vmax.bf16 %v1456_v60, %v589_v53  ;;  %v1102_v0 = vshrl.u32 %v357_v56, 16  ;;  %v433_v19 = vmax.bf16 %v2198_v27, %v2195_v44  ;;  %v601_v3 = vshrl.u32 %v2195_v44, 16  ;;  %v360_v20 = vld [vmem:[%s1909_s13 + $0x4c] sm:$0xf] }
  0x5b   : > { %v594_v8 = vrot.slane %v593_v62, 4  ;;  %v1086_v16 = vrot.slane %v1084_v1, 5  ;;  %v914_v6 = vmax.bf16 %v882_v4, %v2170_v15  ;;  %v1100_v18 = vrot.slane %v1098_v10, 5  ;;  %v2241_v47 = vld [vmem:[%s1891_s6 + $0x54] sm:$0xf] }
  0x5c   : > { %1547 = vst.msk [vmem:[%s2032_s29 + $0x20] sm:$0xf] %vm1538_vm3, %v1514_v7  ;;  %v1104_v21 = vrot.slane %v1102_v0, 4  ;;  %v604_v14 = vshll.u32 %v2195_v44, 16  ;;  %v603_v11 = vrot.slane %v601_v3, 4  ;;  %v610_v26 = vshll.u32 %v2205_v61, 16 }
  0x5d   : > { %v599_v22 = vsel %vm1948_vm2, %v594_v8, %v598_v63  ;;  %v1087_v28 = vsel %vm1948_vm2, %v1082_v59, %v1086_v16  ;;  %v946_v15 = vmax.bf16 %v914_v6, %v399_v13  ;;  %v1096_v37 = vrot.slane %v1095_v58, 4  ;;  %v2244_v58 = vld [vmem:[%s1897_s10 + $0x38] sm:$0xf]  ;;  %v401_v62 = vld [vmem:[%s1962_s23 + $0x30] sm:$0xf] }
  0x5e   : > { %v883_v29 = vmax.bf16 %v599_v22, %v432_v9  ;;  %v1105_v31 = vor.u32 %v1104_v21, %v1100_v18  ;;  %v1393_v32 = vmax.bf16 %v1087_v28, %v945_v54  ;;  %v606_v33 = vrot.slane %v604_v14, 5  ;;  %v2253_v0 = vld [vmem:[%s1891_s6 + $0x58] sm:$0xf]  ;;  %v2262_v6 = vld [vmem:[%s1909_s13 + $0x54] sm:$0xf] }
  0x5f   : > { %v612_v35 = vrot.slane %v610_v26, 5  ;;  %v1113_v40 = vshrl.u32 %v2215_v12, 16  ;;  %v1116_v43 = vshll.u32 %v2215_v12, 16  ;;  %v434_v45 = vmax.bf16 %v2224_v24, %v2205_v61  ;;  %v2268_v28 = vld [vmem:[%s1897_s10 + $0x3c] sm:$0xf] }
  0x60   : > { %v915_v41 = vmax.bf16 %v883_v29, %v357_v56  ;;  %v1425_v42 = vmax.bf16 %v1393_v32, %v2157_v17  ;;  %v607_v2 = vor.u32 %v606_v33, %v603_v11  ;;  %v1101_v39 = vsel %vm1948_vm2, %v1096_v37, %v1100_v18  ;;  %v402_v29 = vld [vmem:[%s1962_s23 + $0x34] sm:$0xf] }
  0x61   : > { %v1115_v46 = vrot.slane %v1113_v40, 4  ;;  %v614_v50 = vshrl.u32 %v2205_v61, 16  ;;  %v1118_v17 = vrot.slane %v1116_v43, 5  ;;  %v1394_v23 = vmax.bf16 %v1101_v39, %v946_v15 }
  0x62   : > { %v947_v9 = vmax.bf16 %v915_v41, %v400_v30  ;;  %v1457_v51 = vmax.bf16 %v1425_v42, %v2176_v36  ;;  %v608_v52 = vrot.slane %v607_v2, 4  ;;  %v620_v49 = vshll.u32 %v276_v38, 16  ;;  %v279_v41 = vld [vmem:[%s1891_s6 + $0x5c] sm:$0x1]  ;;  %v361_v2 = vld [vmem:[%s1909_s13 + $0x50] sm:$0x1] }
  0x63   : > { %v616_v25 = vrot.slane %v614_v50, 4  ;;  %v1106_v54 = vrot.slane %v1105_v31, 4  ;;  %v1119_v56 = vor.u32 %v1118_v17, %v1115_v46  ;;  %v1426_v55 = vmax.bf16 %v1394_v23, %v2195_v44  ;;  %v2285_v50 = vld [vmem:[%s1909_s13 + $0x58] sm:$0xf] }
  0x64   : > { %v1515_v5 = vmax.bf16 %v1457_v51, %v599_v22  ;;  %v1108_v57 = vshll.u32 %v358_v48, 16  ;;  %v613_v36 = vsel %vm1948_vm2, %v608_v52, %v612_v35  ;;  %v622_v59 = vrot.slane %v620_v49, 5 }
  0x65   : > { %v617_v60 = vor.u32 %v616_v25, %v612_v35  ;;  %v1122_v53 = vshll.u32 %v360_v20, 16  ;;  %v884_v63 = vmax.bf16 %v613_v36, %v433_v19  ;;  %v1458_v1 = vmax.bf16 %v1426_v55, %v2198_v27 }
  0x66   : > { %1548 = vst.msk [vmem:[%s2032_s29 + $0x24] sm:$0xf] %vm1538_vm3, %v1515_v5  ;;  %v1110_v44 = vrot.slane %v1108_v57, 5  ;;  %v1126_v4 = vshrl.u32 %v360_v20, 16  ;;  %v435_v13 = vmax.bf16 %v2244_v58, %v2241_v47  ;;  %v625_v8 = vshrl.u32 %v2241_v47, 16 }
  0x67   : > { %v618_v7 = vrot.slane %v617_v60, 4  ;;  %v1124_v10 = vrot.slane %v1122_v53, 5  ;;  %v916_v16 = vmax.bf16 %v884_v63, %v2215_v12  ;;  %v1516_v3 = vmax.bf16 %v1458_v1, %v613_v36  ;;  %v2293_v5 = vld [vmem:[%s1897_s10 + $0x40] sm:$0xf]  ;;  %v403_v60 = vld [vmem:[%s1962_s23 + $0x38] sm:$0xf] }
  0x68   : > { %v1111_v27 = vsel %vm1948_vm2, %v1106_v54, %v1110_v44  ;;  %v1128_v19 = vrot.slane %v1126_v4, 4  ;;  %v627_v14 = vrot.slane %v625_v8, 4  ;;  %v628_v22 = vshll.u32 %v2241_v47, 16  ;;  %v2290_v54 = vld [vmem:[%s1891_s6 + $0x60] sm:$0xf] }
  0x69   : > { %v623_v18 = vsel %vm1948_vm2, %v618_v7, %v622_v59  ;;  %v1395_v21 = vmax.bf16 %v1111_v27, %v947_v9  ;;  %v948_v11 = vmax.bf16 %v916_v16, %v401_v62  ;;  %1549 = vst.msk [vmem:[%s2032_s29 + $0x28] sm:$0xf] %vm1538_vm3, %v1516_v3  ;;  %v634_v15 = vshll.u32 %v2253_v0, 16  ;;  %v2304_v44 = vld [vmem:[%s1891_s6 + $0x64] sm:$0xf] }
  0x6a   : > { %v885_v12 = vmax.bf16 %v623_v18, %v434_v45  ;;  %v1129_v26 = vor.u32 %v1128_v19, %v1124_v10  ;;  %v630_v32 = vrot.slane %v628_v22, 5  ;;  %v1120_v30 = vrot.slane %v1119_v56, 4 }
  0x6b   : > { %v1427_v31 = vmax.bf16 %v1395_v21, %v2205_v61  ;;  %v1137_v33 = vshrl.u32 %v2262_v6, 16  ;;  %v636_v37 = vrot.slane %v634_v15, 5  ;;  %v1140_v40 = vshll.u32 %v2262_v6, 16  ;;  %v2317_v21 = vld [vmem:[%s1897_s10 + $0x44] sm:$0xf] }
  0x6c   : > { %v917_v35 = vmax.bf16 %v885_v12, %v360_v20  ;;  %v436_v42 = vmax.bf16 %v2268_v28, %v2253_v0  ;;  %v631_v38 = vor.u32 %v630_v32, %v627_v14  ;;  %v1125_v45 = vsel %vm1948_vm2, %v1120_v30, %v1124_v10  ;;  %v404_v32 = vld [vmem:[%s1962_s23 + $0x3c] sm:$0xf] }
  0x6d   : > { %v1459_v43 = vmax.bf16 %v1427_v31, %v2224_v24  ;;  %v1139_v61 = vrot.slane %v1137_v33, 4  ;;  %v1142_v46 = vrot.slane %v1140_v40, 5  ;;  %v1396_v48 = vmax.bf16 %v1125_v45, %v948_v11  ;;  %v282_v31 = vld [vmem:[%s1891_s6 + $0x68] sm:$0x1] }
  0x6e   : > { %v949_v39 = vmax.bf16 %v917_v35, %v402_v29  ;;  %v638_v9 = vshrl.u32 %v2253_v0, 16  ;;  %v632_v17 = vrot.slane %v631_v38, 4  ;;  %v644_v24 = vshll.u32 %v279_v41, 16 }
  0x6f   : > { %v1517_v51 = vmax.bf16 %v1459_v43, %v623_v18  ;;  %v1130_v23 = vrot.slane %v1129_v26, 4  ;;  %v1143_v20 = vor.u32 %v1142_v46, %v1139_v61  ;;  %v1428_v52 = vmax.bf16 %v1396_v48, %v2241_v47  ;;  %v364_v43 = vld [vmem:[%s1909_s13 + $0x5c] sm:$0x1]  ;;  %v2337_v61 = vld [vmem:[%s1909_s13 + $0x64] sm:$0xf] }
  0x70   : > { %v640_v25 = vrot.slane %v638_v9, 4  ;;  %v1132_v49 = vshll.u32 %v361_v2, 16  ;;  %v637_v56 = vsel %vm1948_vm2, %v632_v17, %v636_v37  ;;  %v646_v55 = vrot.slane %v644_v24, 5 }
  0x71   : > { %1550 = vst.msk [vmem:[%s2032_s29 + $0x2c] sm:$0xf] %vm1538_vm3, %v1517_v51  ;;  %v1146_v57 = vshll.u32 %v2285_v50, 16  ;;  %v1150_v36 = vshrl.u32 %v2285_v50, 16  ;;  %v886_v47 = vmax.bf16 %v637_v56, %v435_v13  ;;  %v1460_v59 = vmax.bf16 %v1428_v52, %v2244_v58  ;;  %v2313_v13 = vld [vmem:[%s1909_s13 + $0x60] sm:$0xf] }
  0x72   : > { %v641_v53 = vor.u32 %v640_v25, %v636_v37  ;;  %v1134_v62 = vrot.slane %v1132_v49, 5  ;;  %v437_v4 = vmax.bf16 %v2293_v5, %v2290_v54  ;;  %v649_v7 = vshrl.u32 %v2290_v54, 16 }
  0x73   : > { %v1148_v63 = vrot.slane %v1146_v57, 5  ;;  %v1152_v1 = vrot.slane %v1150_v36, 4  ;;  %v918_v10 = vmax.bf16 %v886_v47, %v2262_v6  ;;  %v1518_v8 = vmax.bf16 %v1460_v59, %v637_v56  ;;  %v405_v47 = vld [vmem:[%s1962_s23 + $0x40] sm:$0xf] }
  0x74   : > { %v642_v16 = vrot.slane %v641_v53, 4  ;;  %v1135_v58 = vsel %vm1948_vm2, %v1130_v23, %v1134_v62  ;;  %v651_v19 = vrot.slane %v649_v7, 4  ;;  %v652_v18 = vshll.u32 %v2290_v54, 16 }
  0x75   : > { %v1153_v3 = vor.u32 %v1152_v1, %v1148_v63  ;;  %v1397_v27 = vmax.bf16 %v1135_v58, %v949_v39  ;;  %v950_v14 = vmax.bf16 %v918_v10, %v403_v60  ;;  %1551 = vst.msk [vmem:[%s2032_s29 + $0x30] sm:$0xf] %vm1538_vm3, %v1518_v8  ;;  %v658_v22 = vshll.u32 %v2304_v44, 16  ;;  %v2363_v10 = vld [vmem:[%s1909_s13 + $0x6c] sm:$0xf] }
  0x76   : > { %v647_v6 = vsel %vm1948_vm2, %v642_v16, %v646_v55  ;;  %v1144_v11 = vrot.slane %v1143_v20, 4  ;;  %v654_v15 = vrot.slane %v652_v18, 5  ;;  %v1161_v29 = vshrl.u32 %v2313_v13, 16  ;;  %v2345_v20 = vld [vmem:[%s1891_s6 + $0x6c] sm:$0xf] }
  0x77   : > { %v887_v12 = vmax.bf16 %v647_v6, %v436_v42  ;;  %v1429_v26 = vmax.bf16 %v1397_v27, %v2253_v0  ;;  %v660_v30 = vrot.slane %v658_v22, 5  ;;  %v1164_v35 = vshll.u32 %v2313_v13, 16  ;;  %v2370_v27 = vld [vmem:[%s1897_s10 + $0x4c] sm:$0xf] }
  0x78   : > { %v1149_v33 = vsel %vm1948_vm2, %v1144_v11, %v1148_v63  ;;  %v438_v37 = vmax.bf16 %v2317_v21, %v2304_v44  ;;  %v655_v41 = vor.u32 %v654_v15, %v651_v19  ;;  %v1163_v42 = vrot.slane %v1161_v29, 4 }
  0x79   : > { %v919_v40 = vmax.bf16 %v887_v12, %v2285_v50  ;;  %v1461_v0 = vmax.bf16 %v1429_v26, %v2268_v28  ;;  %v1166_v38 = vrot.slane %v1164_v35, 5  ;;  %v1398_v45 = vmax.bf16 %v1149_v33, %v950_v14  ;;  %v2341_v50 = vld [vmem:[%s1897_s10 + $0x48] sm:$0xf]  ;;  %v406_v26 = vld [vmem:[%s1962_s23 + $0x44] sm:$0xf] }
  0x7a   : > { %v662_v2 = vshrl.u32 %v2304_v44, 16  ;;  %v668_v39 = vshll.u32 %v282_v31, 16  ;;  %v656_v9 = vrot.slane %v655_v41, 4  ;;  %v1154_v51 = vrot.slane %v1153_v3, 4 }
  0x7b   : > { %v951_v46 = vmax.bf16 %v919_v40, %v404_v32  ;;  %v1519_v48 = vmax.bf16 %v1461_v0, %v647_v6  ;;  %v1167_v28 = vor.u32 %v1166_v38, %v1163_v42  ;;  %v1430_v17 = vmax.bf16 %v1398_v45, %v2290_v54  ;;  %v2355_v54 = vld [vmem:[%s1891_s6 + $0x70] sm:$0xf]  ;;  %v285_v32 = vld [vmem:[%s1891_s6 + $0x74] sm:$0x1] }
  0x7c   : > { %v664_v24 = vrot.slane %v662_v2, 4  ;;  %v670_v23 = vrot.slane %v668_v39, 5  ;;  %v661_v52 = vsel %vm1948_vm2, %v656_v9, %v660_v30  ;;  %v1156_v25 = vshll.u32 %v364_v43, 16  ;;  %v367_v43 = vld [vmem:[%s1909_s13 + $0x68] sm:$0x1] }
  0x7d   : > { %1552 = vst.msk [vmem:[%s2032_s29 + $0x34] sm:$0xf] %vm1538_vm3, %v1519_v48  ;;  %v1170_v49 = vshll.u32 %v2337_v61, 16  ;;  %v1174_v56 = vshrl.u32 %v2337_v61, 16  ;;  %v888_v55 = vmax.bf16 %v661_v52, %v437_v4  ;;  %v1462_v57 = vmax.bf16 %v1430_v17, %v2293_v5  ;;  %v369_v38 = vld [vmem:[%s1909_s13 + $0x70] sm:$0xf] }
  0x7e   : > { %v665_v36 = vor.u32 %v664_v24, %v660_v30  ;;  %v439_v60 = vmax.bf16 %v2341_v50, %v2345_v20  ;;  %v1158_v59 = vrot.slane %v1156_v25, 5  ;;  %v673_v63 = vshrl.u32 %v2345_v20, 16  ;;  %v407_v25 = vld [vmem:[%s1962_s23 + $0x48] sm:$0xf] }
  0x7f   : > { %v1172_v53 = vrot.slane %v1170_v49, 5  ;;  %v1176_v62 = vrot.slane %v1174_v56, 4  ;;  %v920_v1 = vmax.bf16 %v888_v55, %v2313_v13  ;;  %v1520_v7 = vmax.bf16 %v1462_v57, %v661_v52 }
  0x80   : > { %v666_v4 = vrot.slane %v665_v36, 4  ;;  %v676_v5 = vshll.u32 %v2345_v20, 16  ;;  %v1159_v8 = vsel %vm1948_vm2, %v1154_v51, %v1158_v59  ;;  %v675_v58 = vrot.slane %v673_v63, 4 }
  0x81   : > { %v1177_v16 = vor.u32 %v1176_v62, %v1172_v53  ;;  %v682_v3 = vshll.u32 %v2355_v54, 16  ;;  %v952_v19 = vmax.bf16 %v920_v1, %v405_v47  ;;  %1553 = vst.msk [vmem:[%s2032_s29 + $0x38] sm:$0xf] %vm1538_vm3, %v1520_v7  ;;  %v1399_v18 = vmax.bf16 %v1159_v8, %v951_v46  ;;  %v2391_v46 = vld [vmem:[%s1897_s10 + $0x50] sm:$0xf] }
  0x82   : > { %v671_v13 = vsel %vm1948_vm2, %v666_v4, %v670_v23  ;;  %v678_v14 = vrot.slane %v676_v5, 5  ;;  %v1168_v11 = vrot.slane %v1167_v28, 4  ;;  %v1185_v12 = vshrl.u32 %v2363_v10, 16  ;;  %v2397_v28 = vld [vmem:[%s1891_s6 + $0x78] sm:$0xf] }
  0x83   : > { %v889_v6 = vmax.bf16 %v671_v13, %v438_v37  ;;  %v684_v22 = vrot.slane %v682_v3, 5  ;;  %v1431_v15 = vmax.bf16 %v1399_v18, %v2304_v44  ;;  %v1188_v31 = vshll.u32 %v2363_v10, 16  ;;  %v2407_v47 = vld [vmem:[%s1891_s6 + $0x7c] sm:$0xf]  ;;  %v2419_v8 = vld [vmem:[%s1897_s10 + $0x54] sm:$0xf] }
  0x84   : > { %v679_v29 = vor.u32 %v678_v14, %v675_v58  ;;  %v440_v30 = vmax.bf16 %v2370_v27, %v2355_v54  ;;  %v1173_v35 = vsel %vm1948_vm2, %v1168_v11, %v1172_v53  ;;  %v1187_v37 = vrot.slane %v1185_v12, 4 }
  0x85   : > { %v921_v33 = vmax.bf16 %v889_v6, %v2337_v61  ;;  %v686_v40 = vshrl.u32 %v2355_v54, 16  ;;  %v1463_v0 = vmax.bf16 %v1431_v15, %v2317_v21  ;;  %v1190_v41 = vrot.slane %v1188_v31, 5  ;;  %v288_v15 = vld [vmem:[%s1891_s6 + $0x80] sm:$0x1] }
  0x86   : > { %v680_v44 = vrot.slane %v679_v29, 4  ;;  %v1400_v42 = vmax.bf16 %v1173_v35, %v952_v19  ;;  %v692_v39 = vshll.u32 %v285_v32, 16  ;;  %v1178_v61 = vrot.slane %v1177_v16, 4  ;;  %v370_v35 = vld [vmem:[%s1909_s13 + $0x74] sm:$0x1] }
  0x87   : > { %v953_v45 = vmax.bf16 %v921_v33, %v406_v26  ;;  %v688_v2 = vrot.slane %v686_v40, 4  ;;  %v1521_v48 = vmax.bf16 %v1463_v0, %v671_v13  ;;  %v1191_v51 = vor.u32 %v1190_v41, %v1187_v37  ;;  %v408_v13 = vld [vmem:[%s1962_s23 + $0x4c] sm:$0xf] }
  0x88   : > { %v685_v9 = vsel %vm1948_vm2, %v680_v44, %v684_v22  ;;  %v1432_v21 = vmax.bf16 %v1400_v42, %v2345_v20  ;;  %v694_v23 = vrot.slane %v692_v39, 5  ;;  %v1180_v52 = vshll.u32 %v367_v43, 16 }
  0x89   : > { %v890_v17 = vmax.bf16 %v685_v9, %v439_v60  ;;  %v689_v24 = vor.u32 %v688_v2, %v684_v22  ;;  %1554 = vst.msk [vmem:[%s2032_s29 + $0x3c] sm:$0xf] %vm1538_vm3, %v1521_v48  ;;  %v1194_v56 = vshll.u32 %v369_v38, 16  ;;  %v1198_v55 = vshrl.u32 %v369_v38, 16  ;;  %v2446_v48 = vld [vmem:[%s1891_s6 + $0x84] sm:$0xf] }
  0x8a   : > { %v1464_v49 = vmax.bf16 %v1432_v21, %v2341_v50  ;;  %v441_v57 = vmax.bf16 %v2391_v46, %v2397_v28  ;;  %v1182_v60 = vrot.slane %v1180_v52, 5  ;;  %v697_v59 = vshrl.u32 %v2397_v28, 16  ;;  %v2411_v50 = vld [vmem:[%s1909_s13 + $0x78] sm:$0xf] }
  0x8b   : > { %v922_v20 = vmax.bf16 %v890_v17, %v2363_v10  ;;  %v690_v36 = vrot.slane %v689_v24, 4  ;;  %v1196_v62 = vrot.slane %v1194_v56, 5  ;;  %v1200_v63 = vrot.slane %v1198_v55, 4  ;;  %v409_v24 = vld [vmem:[%s1962_s23 + $0x50] sm:$0xf] }
  0x8c   : > { %v1522_v53 = vmax.bf16 %v1464_v49, %v685_v9  ;;  %v700_v1 = vshll.u32 %v2397_v28, 16  ;;  %v1183_v10 = vsel %vm1948_vm2, %v1178_v61, %v1182_v60  ;;  %v699_v5 = vrot.slane %v697_v59, 4  ;;  %v2464_v59 = vld [vmem:[%s1909_s13 + $0x84] sm:$0xf] }
  0x8d   : > { %v954_v7 = vmax.bf16 %v922_v20, %v407_v25  ;;  %v695_v4 = vsel %vm1948_vm2, %v690_v36, %v694_v23  ;;  %v1201_v58 = vor.u32 %v1200_v63, %v1196_v62  ;;  %v1401_v3 = vmax.bf16 %v1183_v10, %v953_v45  ;;  %v2440_v45 = vld [vmem:[%s1897_s10 + $0x58] sm:$0xf] }
  0x8e   : > { %1555 = vst.msk [vmem:[%s2032_s29 + $0x40] sm:$0xf] %vm1538_vm3, %v1522_v53  ;;  %v891_v16 = vmax.bf16 %v695_v4, %v440_v30  ;;  %v702_v19 = vrot.slane %v700_v1, 5  ;;  %v706_v18 = vshll.u32 %v2407_v47, 16  ;;  %v1192_v14 = vrot.slane %v1191_v51, 4 }
  0x8f   : > { %v1209_v6 = vshrl.u32 %v2411_v50, 16  ;;  %v1212_v22 = vshll.u32 %v2411_v50, 16  ;;  %v1433_v12 = vmax.bf16 %v1401_v3, %v2355_v54  ;;  %v442_v29 = vmax.bf16 %v2419_v8, %v2407_v47  ;;  %v2436_v54 = vld [vmem:[%s1909_s13 + $0x7c] sm:$0xf] }
  0x90   : > { %v923_v11 = vmax.bf16 %v891_v16, %v369_v38  ;;  %v703_v26 = vor.u32 %v702_v19, %v699_v5  ;;  %v708_v31 = vrot.slane %v706_v18, 5  ;;  %v1197_v32 = vsel %vm1948_vm2, %v1192_v14, %v1196_v62 }
  0x91   : > { %v1211_v30 = vrot.slane %v1209_v6, 4  ;;  %v1214_v33 = vrot.slane %v1212_v22, 5  ;;  %v1465_v40 = vmax.bf16 %v1433_v12, %v2370_v27  ;;  %v1402_v44 = vmax.bf16 %v1197_v32, %v954_v7  ;;  %v410_v12 = vld [vmem:[%s1962_s23 + $0x54] sm:$0xf] }
  0x92   : > { %v955_v37 = vmax.bf16 %v923_v11, %v408_v13  ;;  %v704_v0 = vrot.slane %v703_v26, 4  ;;  %v710_v42 = vshrl.u32 %v2407_v47, 16  ;;  %v716_v43 = vshll.u32 %v288_v15, 16  ;;  %v2476_v13 = vld [vmem:[%s1897_s10 + $0x5c] sm:$0xf] }
  0x93   : > { %v1215_v41 = vor.u32 %v1214_v33, %v1211_v30  ;;  %v1202_v38 = vrot.slane %v1201_v58, 4  ;;  %v1523_v2 = vmax.bf16 %v1465_v40, %v695_v4  ;;  %v1434_v61 = vmax.bf16 %v1402_v44, %v2397_v28  ;;  %v291_v11 = vld [vmem:[%s1891_s6 + $0x8c] sm:$0x1] }
  0x94   : > { %v709_v39 = vsel %vm1948_vm2, %v704_v0, %v708_v31  ;;  %v1204_v27 = vshll.u32 %v370_v35, 16  ;;  %v712_v51 = vrot.slane %v710_v42, 4  ;;  %v718_v21 = vrot.slane %v716_v43, 5 }
  0x95   : > { %v892_v9 = vmax.bf16 %v709_v39, %v441_v57  ;;  %v1218_v17 = vshll.u32 %v2436_v54, 16  ;;  %1556 = vst.msk [vmem:[%s2032_s29 + $0x44] sm:$0xf] %vm1538_vm3, %v1523_v2  ;;  %v1466_v23 = vmax.bf16 %v1434_v61, %v2391_v46  ;;  %v1222_v25 = vshrl.u32 %v2436_v54, 16  ;;  %v2458_v57 = vld [vmem:[%s1891_s6 + $0x88] sm:$0xf] }
  0x96   : > { %v1206_v52 = vrot.slane %v1204_v27, 5  ;;  %v443_v28 = vmax.bf16 %v2440_v45, %v2446_v48  ;;  %v713_v56 = vor.u32 %v712_v51, %v708_v31  ;;  %v721_v20 = vshrl.u32 %v2446_v48, 16  ;;  %v2496_v2 = vld [vmem:[%s1891_s6 + $0x90] sm:$0xf] }
  0x97   : > { %v924_v49 = vmax.bf16 %v892_v9, %v2411_v50  ;;  %v1220_v55 = vrot.slane %v1218_v17, 5  ;;  %v1524_v36 = vmax.bf16 %v1466_v23, %v709_v39  ;;  %v1224_v46 = vrot.slane %v1222_v25, 4  ;;  %v411_v9 = vld [vmem:[%s1962_s23 + $0x58] sm:$0xf] }
  0x98   : > { %v1207_v60 = vsel %vm1948_vm2, %v1202_v38, %v1206_v52  ;;  %v724_v53 = vshll.u32 %v2446_v48, 16  ;;  %v714_v63 = vrot.slane %v713_v56, 4  ;;  %v723_v50 = vrot.slane %v721_v20, 4  ;;  %v2510_v20 = vld [vmem:[%s1909_s13 + $0x90] sm:$0xf] }
  0x99   : > { %v956_v62 = vmax.bf16 %v924_v49, %v409_v24  ;;  %v1403_v1 = vmax.bf16 %v1207_v60, %v955_v37  ;;  %1557 = vst.msk [vmem:[%s2032_s29 + $0x48] sm:$0xf] %vm1538_vm3, %v1524_v36  ;;  %v1225_v7 = vor.u32 %v1224_v46, %v1220_v55  ;;  %v730_v10 = vshll.u32 %v2458_v57, 16  ;;  %v2503_v24 = vld [vmem:[%s1891_s6 + $0x94] sm:$0xf] }
  0x9a   : > { %v726_v4 = vrot.slane %v724_v53, 5  ;;  %v1216_v5 = vrot.slane %v1215_v41, 4  ;;  %v719_v16 = vsel %vm1948_vm2, %v714_v63, %v718_v21  ;;  %v1233_v3 = vshrl.u32 %v2464_v59, 16  ;;  %v2491_v41 = vld [vmem:[%s1897_s10 + $0x60] sm:$0xf] }
  0x9b   : > { %v1435_v58 = vmax.bf16 %v1403_v1, %v2407_v47  ;;  %v1236_v19 = vshll.u32 %v2464_v59, 16  ;;  %v893_v18 = vmax.bf16 %v719_v16, %v442_v29  ;;  %v732_v6 = vrot.slane %v730_v10, 5  ;;  %v373_v29 = vld [vmem:[%s1909_s13 + $0x80] sm:$0x1] }
  0x9c   : > { %v727_v14 = vor.u32 %v726_v4, %v723_v50  ;;  %v1221_v22 = vsel %vm1948_vm2, %v1216_v5, %v1220_v55  ;;  %v1235_v47 = vrot.slane %v1233_v3, 4  ;;  %v444_v33 = vmax.bf16 %v2476_v13, %v2458_v57 }
  0x9d   : > { %v1467_v26 = vmax.bf16 %v1435_v58, %v2419_v8  ;;  %v1238_v15 = vrot.slane %v1236_v19, 5  ;;  %v1404_v31 = vmax.bf16 %v1221_v22, %v956_v62  ;;  %v925_v32 = vmax.bf16 %v893_v18, %v2436_v54  ;;  %v375_v8 = vld [vmem:[%s1909_s13 + $0x88] sm:$0xf]  ;;  %v2519_v62 = vld [vmem:[%s1897_s10 + $0x64] sm:$0xf] }
  0x9e   : > { %v728_v30 = vrot.slane %v727_v14, 4  ;;  %v734_v35 = vshrl.u32 %v2458_v57, 16  ;;  %v740_v44 = vshll.u32 %v291_v11, 16  ;;  %v1226_v38 = vrot.slane %v1225_v7, 4  ;;  %v412_v58 = vld [vmem:[%s1962_s23 + $0x5c] sm:$0xf] }
  0x9f   : > { %v1525_v37 = vmax.bf16 %v1467_v26, %v719_v16  ;;  %v1239_v40 = vor.u32 %v1238_v15, %v1235_v47  ;;  %v1436_v0 = vmax.bf16 %v1404_v31, %v2446_v48  ;;  %v957_v42 = vmax.bf16 %v925_v32, %v410_v12  ;;  %v294_v14 = vld [vmem:[%s1891_s6 + $0x98] sm:$0x1]  ;;  %v376_v32 = vld [vmem:[%s1909_s13 + $0x8c] sm:$0x1] }
  0xa0   : > { %v733_v54 = vsel %vm1948_vm2, %v728_v30, %v732_v6  ;;  %v736_v43 = vrot.slane %v734_v35, 4  ;;  %v742_v27 = vrot.slane %v740_v44, 5  ;;  %v1228_v48 = vshll.u32 %v373_v29, 16  ;;  %v378_v30 = vld [vmem:[%s1909_s13 + $0x94] sm:$0xf] }
  0xa1   : > { %1558 = vst.msk [vmem:[%s2032_s29 + $0x4c] sm:$0xf] %vm1538_vm3, %v1525_v37  ;;  %v894_v39 = vmax.bf16 %v733_v54, %v443_v28  ;;  %v1468_v61 = vmax.bf16 %v1436_v0, %v2440_v45  ;;  %v1242_v21 = vshll.u32 %v375_v8, 16  ;;  %v1246_v17 = vshrl.u32 %v375_v8, 16 }
  0xa2   : > { %v737_v51 = vor.u32 %v736_v43, %v732_v6  ;;  %v445_v23 = vmax.bf16 %v2491_v41, %v2496_v2  ;;  %v1230_v28 = vrot.slane %v1228_v48, 5  ;;  %v745_v45 = vshrl.u32 %v2496_v2, 16 }
  0xa3   : > { %v926_v52 = vmax.bf16 %v894_v39, %v2464_v59  ;;  %v1526_v25 = vmax.bf16 %v1468_v61, %v733_v54  ;;  %v1244_v56 = vrot.slane %v1242_v21, 5  ;;  %v1248_v55 = vrot.slane %v1246_v17, 4  ;;  %v413_v61 = vld [vmem:[%s1962_s23 + $0x60] sm:$0xf] }
  0xa4   : > { %v738_v49 = vrot.slane %v737_v51, 4  ;;  %v748_v36 = vshll.u32 %v2496_v2, 16  ;;  %v1231_v46 = vsel %vm1948_vm2, %v1226_v38, %v1230_v28  ;;  %v747_v59 = vrot.slane %v745_v45, 4 }
  0xa5   : > { %v958_v60 = vmax.bf16 %v926_v52, %v411_v9  ;;  %1559 = vst.msk [vmem:[%s2032_s29 + $0x50] sm:$0xf] %vm1538_vm3, %v1526_v25  ;;  %v754_v53 = vshll.u32 %v2503_v24, 16  ;;  %v1249_v1 = vor.u32 %v1248_v55, %v1244_v56  ;;  %v1405_v50 = vmax.bf16 %v1231_v46, %v957_v42  ;;  %v2543_v42 = vld [vmem:[%s1891_s6 + $0x9c] sm:$0xf] }
  0xa6   : > { %v743_v63 = vsel %vm1948_vm2, %v738_v49, %v742_v27  ;;  %v750_v7 = vrot.slane %v748_v36, 5  ;;  %v1240_v5 = vrot.slane %v1239_v40, 4  ;;  %v1257_v16 = vshrl.u32 %v2510_v20, 16  ;;  %v2537_v40 = vld [vmem:[%s1897_s10 + $0x68] sm:$0xf] }
  0xa7   : > { %v895_v4 = vmax.bf16 %v743_v63, %v444_v33  ;;  %v756_v10 = vrot.slane %v754_v53, 5  ;;  %v1437_v3 = vmax.bf16 %v1405_v50, %v2458_v57  ;;  %v1260_v18 = vshll.u32 %v2510_v20, 16 }
  0xa8   : > { %v751_v19 = vor.u32 %v750_v7, %v747_v59  ;;  %v446_v6 = vmax.bf16 %v2519_v62, %v2503_v24  ;;  %v1245_v11 = vsel %vm1948_vm2, %v1240_v5, %v1244_v56  ;;  %v1259_v12 = vrot.slane %v1257_v16, 4 }
  0xa9   : > { %v927_v22 = vmax.bf16 %v895_v4, %v375_v8  ;;  %v758_v26 = vshrl.u32 %v2503_v24, 16  ;;  %v1469_v47 = vmax.bf16 %v1437_v3, %v2476_v13  ;;  %v1262_v57 = vrot.slane %v1260_v18, 5  ;;  %v297_v3 = vld [vmem:[%s1891_s6 + $0xa4] sm:$0x1] }
  0xaa   : > { %v752_v15 = vrot.slane %v751_v19, 4  ;;  %v1406_v31 = vmax.bf16 %v1245_v11, %v958_v60  ;;  %v764_v35 = vshll.u32 %v294_v14, 16  ;;  %v1250_v37 = vrot.slane %v1249_v1, 4  ;;  %v2565_v60 = vld [vmem:[%s1897_s10 + $0x6c] sm:$0xf] }
  0xab   : > { %v959_v29 = vmax.bf16 %v927_v22, %v412_v58  ;;  %v760_v33 = vrot.slane %v758_v26, 4  ;;  %v1527_v0 = vmax.bf16 %v1469_v47, %v743_v63  ;;  %v1263_v44 = vor.u32 %v1262_v57, %v1259_v12  ;;  %v414_v1 = vld [vmem:[%s1962_s23 + $0x64] sm:$0xf]  ;;  %v379_v11 = vld [vmem:[%s1909_s13 + $0x98] sm:$0x1] }
  0xac   : > { %v757_v8 = vsel %vm1948_vm2, %v752_v15, %v756_v10  ;;  %v1438_v13 = vmax.bf16 %v1406_v31, %v2496_v2  ;;  %v766_v38 = vrot.slane %v764_v35, 5  ;;  %v1252_v39 = vshll.u32 %v376_v32, 16 }
  0xad   : > { %v896_v54 = vmax.bf16 %v757_v8, %v445_v23  ;;  %v761_v43 = vor.u32 %v760_v33, %v756_v10  ;;  %1560 = vst.msk [vmem:[%s2032_s29 + $0x54] sm:$0xf] %vm1538_vm3, %v1527_v0  ;;  %v1266_v48 = vshll.u32 %v378_v30, 16  ;;  %v1270_v9 = vshrl.u32 %v378_v30, 16  ;;  %v2553_v23 = vld [vmem:[%s1891_s6 + $0xa0] sm:$0xf] }
  0xae   : > { %v1470_v27 = vmax.bf16 %v1438_v13, %v2491_v41  ;;  %v447_v51 = vmax.bf16 %v2537_v40, %v2543_v42  ;;  %v1254_v17 = vrot.slane %v1252_v39, 5  ;;  %v769_v52 = vshrl.u32 %v2543_v42, 16  ;;  %v2557_v41 = vld [vmem:[%s1909_s13 + $0x9c] sm:$0xf]  ;;  %v2592_v0 = vld [vmem:[%s1891_s6 + $0xa8] sm:$0xf] }
  0xaf   : > { %v928_v2 = vmax.bf16 %v896_v54, %v2510_v20  ;;  %v762_v21 = vrot.slane %v761_v43, 4  ;;  %v1268_v28 = vrot.slane %v1266_v48, 5  ;;  %v1272_v45 = vrot.slane %v1270_v9, 4  ;;  %v415_v43 = vld [vmem:[%s1962_s23 + $0x68] sm:$0xf] }
  0xb0   : > { %v1528_v25 = vmax.bf16 %v1470_v27, %v757_v8  ;;  %v772_v49 = vshll.u32 %v2543_v42, 16  ;;  %v1255_v20 = vsel %vm1948_vm2, %v1250_v37, %v1254_v17  ;;  %v771_v36 = vrot.slane %v769_v52, 4  ;;  %v2610_v52 = vld [vmem:[%s1909_s13 + $0xa8] sm:$0xf] }
  0xb1   : > { %v960_v56 = vmax.bf16 %v928_v2, %v413_v61  ;;  %v767_v55 = vsel %vm1948_vm2, %v762_v21, %v766_v38  ;;  %v1273_v59 = vor.u32 %v1272_v45, %v1268_v28  ;;  %v1407_v53 = vmax.bf16 %v1255_v20, %v959_v29  ;;  %v2586_v29 = vld [vmem:[%s1897_s10 + $0x70] sm:$0xf] }
  0xb2   : > { %1561 = vst.msk [vmem:[%s2032_s29 + $0x58] sm:$0xf] %vm1538_vm3, %v1528_v25  ;;  %v897_v46 = vmax.bf16 %v767_v55, %v446_v6  ;;  %v774_v63 = vrot.slane %v772_v49, 5  ;;  %v778_v50 = vshll.u32 %v2553_v23, 16  ;;  %v1264_v7 = vrot.slane %v1263_v44, 4 }
  0xb3   : > { %v1281_v4 = vshrl.u32 %v2557_v41, 16  ;;  %v1284_v10 = vshll.u32 %v2557_v41, 16  ;;  %v1439_v16 = vmax.bf16 %v1407_v53, %v2503_v24  ;;  %v448_v19 = vmax.bf16 %v2565_v60, %v2553_v23  ;;  %v2582_v24 = vld [vmem:[%s1909_s13 + $0xa0] sm:$0xf] }
  0xb4   : > { %v929_v5 = vmax.bf16 %v897_v46, %v378_v30  ;;  %v775_v58 = vor.u32 %v774_v63, %v771_v36  ;;  %v780_v18 = vrot.slane %v778_v50, 5  ;;  %v1269_v14 = vsel %vm1948_vm2, %v1264_v7, %v1268_v28 }
  0xb5   : > { %v1283_v6 = vrot.slane %v1281_v4, 4  ;;  %v1286_v22 = vrot.slane %v1284_v10, 5  ;;  %v1471_v26 = vmax.bf16 %v1439_v16, %v2519_v62  ;;  %v1408_v15 = vmax.bf16 %v1269_v14, %v960_v56  ;;  %v416_v16 = vld [vmem:[%s1962_s23 + $0x6c] sm:$0xf] }
  0xb6   : > { %v961_v12 = vmax.bf16 %v929_v5, %v414_v1  ;;  %v776_v47 = vrot.slane %v775_v58, 4  ;;  %v782_v31 = vshrl.u32 %v2553_v23, 16  ;;  %v788_v32 = vshll.u32 %v297_v3, 16  ;;  %v2622_v1 = vld [vmem:[%s1897_s10 + $0x74] sm:$0xf] }
  0xb7   : > { %v1287_v57 = vor.u32 %v1286_v22, %v1283_v6  ;;  %v1274_v30 = vrot.slane %v1273_v59, 4  ;;  %v1529_v33 = vmax.bf16 %v1471_v26, %v767_v55  ;;  %v1440_v37 = vmax.bf16 %v1408_v15, %v2543_v42  ;;  %v300_v5 = vld [vmem:[%s1891_s6 + $0xb0] sm:$0x1] }
  0xb8   : > { %v781_v35 = vsel %vm1948_vm2, %v776_v47, %v780_v18  ;;  %v1276_v62 = vshll.u32 %v379_v11, 16  ;;  %v784_v44 = vrot.slane %v782_v31, 4  ;;  %v790_v13 = vrot.slane %v788_v32, 5 }
  0xb9   : > { %v898_v8 = vmax.bf16 %v781_v35, %v447_v51  ;;  %v1290_v54 = vshll.u32 %v2582_v24, 16  ;;  %1562 = vst.msk [vmem:[%s2032_s29 + $0x5c] sm:$0xf] %vm1538_vm3, %v1529_v33  ;;  %v1472_v38 = vmax.bf16 %v1440_v37, %v2537_v40  ;;  %v1294_v61 = vshrl.u32 %v2582_v24, 16  ;;  %v2604_v51 = vld [vmem:[%s1891_s6 + $0xac] sm:$0xf] }
  0xba   : > { %v1278_v39 = vrot.slane %v1276_v62, 5  ;;  %v449_v42 = vmax.bf16 %v2586_v29, %v2592_v0  ;;  %v785_v48 = vor.u32 %v784_v44, %v780_v18  ;;  %v793_v2 = vshrl.u32 %v2592_v0, 16  ;;  %v2642_v33 = vld [vmem:[%s1891_s6 + $0xb4] sm:$0xf] }
  0xbb   : > { %v930_v27 = vmax.bf16 %v898_v8, %v2557_v41  ;;  %v1292_v9 = vrot.slane %v1290_v54, 5  ;;  %v1530_v21 = vmax.bf16 %v1472_v38, %v781_v35  ;;  %v1296_v40 = vrot.slane %v1294_v61, 4  ;;  %v417_v8 = vld [vmem:[%s1962_s23 + $0x70] sm:$0xf] }
  0xbc   : > { %v1279_v17 = vsel %vm1948_vm2, %v1274_v30, %v1278_v39  ;;  %v796_v25 = vshll.u32 %v2592_v0, 16  ;;  %v786_v45 = vrot.slane %v785_v48, 4  ;;  %v795_v41 = vrot.slane %v793_v2, 4  ;;  %v386_v2 = vld [vmem:[%s1909_s13 + $0xb4] sm:$0xf] }
  0xbd   : > { %v962_v28 = vmax.bf16 %v930_v27, %v415_v43  ;;  %v1409_v49 = vmax.bf16 %v1279_v17, %v961_v12  ;;  %1563 = vst.msk [vmem:[%s2032_s29 + $0x60] sm:$0xf] %vm1538_vm3, %v1530_v21  ;;  %v1297_v56 = vor.u32 %v1296_v40, %v1292_v9  ;;  %v802_v20 = vshll.u32 %v2604_v51, 16  ;;  %v2649_v43 = vld [vmem:[%s1891_s6 + $0xb8] sm:$0xf] }
  0xbe   : > { %v798_v55 = vrot.slane %v796_v25, 5  ;;  %v1288_v36 = vrot.slane %v1287_v57, 4  ;;  %v791_v46 = vsel %vm1948_vm2, %v786_v45, %v790_v13  ;;  %v1305_v53 = vshrl.u32 %v2610_v52, 16  ;;  %v2637_v57 = vld [vmem:[%s1897_s10 + $0x78] sm:$0xf] }
  0xbf   : > { %v1441_v59 = vmax.bf16 %v1409_v49, %v2553_v23  ;;  %v1308_v63 = vshll.u32 %v2610_v52, 16  ;;  %v899_v50 = vmax.bf16 %v791_v46, %v448_v19  ;;  %v804_v4 = vrot.slane %v802_v20, 5  ;;  %v382_v19 = vld [vmem:[%s1909_s13 + $0xa4] sm:$0x1] }
  0xc0   : > { %v799_v7 = vor.u32 %v798_v55, %v795_v41  ;;  %v1293_v10 = vsel %vm1948_vm2, %v1288_v36, %v1292_v9  ;;  %v1307_v23 = vrot.slane %v1305_v53, 4  ;;  %v450_v22 = vmax.bf16 %v2622_v1, %v2604_v51 }
  0xc1   : > { %v1473_v58 = vmax.bf16 %v1441_v59, %v2565_v60  ;;  %v1310_v3 = vrot.slane %v1308_v63, 5  ;;  %v1410_v18 = vmax.bf16 %v1293_v10, %v962_v28  ;;  %v931_v14 = vmax.bf16 %v899_v50, %v2582_v24  ;;  %v384_v60 = vld [vmem:[%s1909_s13 + $0xac] sm:$0xf]  ;;  %v2663_v28 = vld [vmem:[%s1897_s10 + $0x7c] sm:$0xf] }
  0xc2   : > { %v800_v6 = vrot.slane %v799_v7, 4  ;;  %v806_v11 = vshrl.u32 %v2604_v51, 16  ;;  %v812_v15 = vshll.u32 %v300_v5, 16  ;;  %v1298_v30 = vrot.slane %v1297_v56, 4  ;;  %v418_v59 = vld [vmem:[%s1962_s23 + $0x74] sm:$0xf] }
  0xc3   : > { %v1531_v12 = vmax.bf16 %v1473_v58, %v791_v46  ;;  %v1311_v26 = vor.u32 %v1310_v3, %v1307_v23  ;;  %v1442_v47 = vmax.bf16 %v1410_v18, %v2592_v0  ;;  %v963_v31 = vmax.bf16 %v931_v14, %v416_v16  ;;  %v303_v7 = vld [vmem:[%s1891_s6 + $0xbc] sm:$0x1] }
  0xc4   : > { %v805_v24 = vsel %vm1948_vm2, %v800_v6, %v804_v4  ;;  %v808_v32 = vrot.slane %v806_v11, 4  ;;  %v814_v62 = vrot.slane %v812_v15, 5  ;;  %v1300_v0 = vshll.u32 %v382_v19, 16  ;;  %v387_v19 = vld [vmem:[%s1909_s13 + $0xb8] sm:$0xf] }
  0xc5   : > { %1564 = vst.msk [vmem:[%s2032_s29 + $0x64] sm:$0xf] %vm1538_vm3, %v1531_v12  ;;  %v900_v35 = vmax.bf16 %v805_v24, %v449_v42  ;;  %v1474_v37 = vmax.bf16 %v1442_v47, %v2586_v29  ;;  %v1314_v13 = vshll.u32 %v384_v60, 16  ;;  %v1318_v54 = vshrl.u32 %v384_v60, 16 }
  0xc6   : > { %v809_v44 = vor.u32 %v808_v32, %v804_v4  ;;  %v451_v38 = vmax.bf16 %v2637_v57, %v2642_v33  ;;  %v1302_v42 = vrot.slane %v1300_v0, 5  ;;  %v817_v29 = vshrl.u32 %v2642_v33, 16 }
  0xc7   : > { %v932_v39 = vmax.bf16 %v900_v35, %v2610_v52  ;;  %v1532_v61 = vmax.bf16 %v1474_v37, %v805_v24  ;;  %v1316_v48 = vrot.slane %v1314_v13, 5  ;;  %v1320_v9 = vrot.slane %v1318_v54, 4  ;;  %v419_v35 = vld [vmem:[%s1962_s23 + $0x78] sm:$0xf] }
  0xc8   : > { %v810_v27 = vrot.slane %v809_v44, 4  ;;  %v820_v21 = vshll.u32 %v2642_v33, 16  ;;  %v1303_v40 = vsel %vm1948_vm2, %v1298_v30, %v1302_v42  ;;  %v819_v25 = vrot.slane %v817_v29, 4 }
  0xc9   : > { %v964_v17 = vmax.bf16 %v932_v39, %v417_v8  ;;  %1565 = vst.msk [vmem:[%s2032_s29 + $0x68] sm:$0xf] %vm1538_vm3, %v1532_v61  ;;  %v826_v52 = vshll.u32 %v2649_v43, 16  ;;  %v1321_v49 = vor.u32 %v1320_v9, %v1316_v48  ;;  %v1411_v41 = vmax.bf16 %v1303_v40, %v963_v31 }
  0xca   : > { %v815_v45 = vsel %vm1948_vm2, %v810_v27, %v814_v62  ;;  %v822_v56 = vrot.slane %v820_v21, 5  ;;  %v1312_v36 = vrot.slane %v1311_v26, 4  ;;  %v1329_v46 = vshrl.u32 %v386_v2, 16  ;;  %v388_v27 = vld [vmem:[%s1909_s13 + $0xbc] sm:$0x1] }
  0xcb   : > { %v901_v55 = vmax.bf16 %v815_v45, %v450_v22  ;;  %v828_v20 = vrot.slane %v826_v52, 5  ;;  %v1443_v53 = vmax.bf16 %v1411_v41, %v2604_v51  ;;  %v1332_v50 = vshll.u32 %v386_v2, 16  ;;  %v385_v51 = vld [vmem:[%s1909_s13 + $0xb0] sm:$0x1] }
  0xcc   : > { %v823_v63 = vor.u32 %v822_v56, %v819_v25  ;;  %v452_v4 = vmax.bf16 %v2663_v28, %v2649_v43  ;;  %v1317_v5 = vsel %vm1948_vm2, %v1312_v36, %v1316_v48  ;;  %v1331_v16 = vrot.slane %v1329_v46, 4  ;;  %v306_v56 = vld [vmem:[%s1891_s6 + $0xc8] sm:$0x1]  ;;  %v339_v46 = vld [vmem:[%s1897_s10 + $0x80] sm:$0xf] }
  0xcd   : > { %v933_v10 = vmax.bf16 %v901_v55, %v384_v60  ;;  %v830_v58 = vshrl.u32 %v2649_v43, 16  ;;  %v1475_v23 = vmax.bf16 %v1443_v53, %v2622_v1  ;;  %v1334_v18 = vrot.slane %v1332_v50, 5  ;;  %v304_v1 = vld [vmem:[%s1891_s6 + $0xc0] sm:$0xf] }
  0xce   : > { %v824_v3 = vrot.slane %v823_v63, 4  ;;  %v1412_v14 = vmax.bf16 %v1317_v5, %v964_v17  ;;  %v836_v11 = vshll.u32 %v303_v7, 16  ;;  %v1322_v12 = vrot.slane %v1321_v49, 4 }
  0xcf   : > { %v965_v6 = vmax.bf16 %v933_v10, %v418_v59  ;;  %v832_v22 = vrot.slane %v830_v58, 4  ;;  %v1533_v26 = vmax.bf16 %v1475_v23, %v815_v45  ;;  %v1335_v60 = vor.u32 %v1334_v18, %v1331_v16 }
  0xd0   : > { %v829_v47 = vsel %vm1948_vm2, %v824_v3, %v828_v20  ;;  %v1444_v15 = vmax.bf16 %v1412_v14, %v2642_v33  ;;  %v838_v32 = vrot.slane %v836_v11, 5  ;;  %v1324_v30 = vshll.u32 %v385_v51, 16  ;;  %v305_v33 = vld [vmem:[%s1891_s6 + $0xc4] sm:$0xf] }
  0xd1   : > { %v902_v31 = vmax.bf16 %v829_v47, %v451_v38  ;;  %v833_v24 = vor.u32 %v832_v22, %v828_v20  ;;  %1566 = vst.msk [vmem:[%s2032_s29 + $0x6c] sm:$0xf] %vm1538_vm3, %v1533_v26  ;;  %v1338_v62 = vshll.u32 %v387_v19, 16  ;;  %v1342_v0 = vshrl.u32 %v387_v19, 16 }
  0xd2   : > { %v1476_v37 = vmax.bf16 %v1444_v15, %v2637_v57  ;;  %v1336_v8 = vrot.slane %v1335_v60, 4  ;;  %v1326_v54 = vrot.slane %v1324_v30, 5  ;;  %v1481_v39 = vshrl.u32 %v304_v1, 16 }
  0xd3   : > { %v934_v44 = vmax.bf16 %v902_v31, %v386_v2  ;;  %v834_v13 = vrot.slane %v833_v24, 4  ;;  %v1340_v61 = vrot.slane %v1338_v62, 5  ;;  %v1344_v42 = vrot.slane %v1342_v0, 4  ;;  %v420_v2 = vld [vmem:[%s1962_s23 + $0x7c] sm:$0xf] }
  0xd4   : > { %v1534_v38 = vmax.bf16 %v1476_v37, %v829_v47  ;;  %v1484_v29 = vshll.u32 %v304_v1, 16  ;;  %v1327_v9 = vsel %vm1948_vm2, %v1322_v12, %v1326_v54  ;;  %v1483_v21 = vrot.slane %v1481_v39, 4 }
  0xd5   : > { %v966_v48 = vmax.bf16 %v934_v44, %v419_v35  ;;  %v839_v57 = vsel %vm1948_vm2, %v834_v13, %v838_v32  ;;  %v1345_v40 = vor.u32 %v1344_v42, %v1340_v61  ;;  %v1413_v25 = vmax.bf16 %v1327_v9, %v965_v6 }
  0xd6   : > { %1567 = vst.msk [vmem:[%s2032_s29 + $0x70] sm:$0xf] %vm1538_vm3, %v1534_v38  ;;  %v903_v17 = vmax.bf16 %v839_v57, %v452_v4  ;;  %v1341_v52 = vsel %vm1948_vm2, %v1336_v8, %v1340_v61  ;;  %v1486_v49 = vrot.slane %v1484_v29, 5  ;;  %v1490_v41 = vshll.u32 %v305_v33, 16 }
  0xd7   : > { %v1414_v45 = vmax.bf16 %v1341_v52, %v966_v48  ;;  %v1348_v55 = vshll.u32 %v388_v27, 16  ;;  %v1445_v36 = vmax.bf16 %v1413_v25, %v2649_v43  ;;  %v1346_v59 = vrot.slane %v1345_v40, 4 }
  0xd8   : > { %v935_v20 = vmax.bf16 %v903_v17, %v387_v19  ;;  %v1494_v53 = vshrl.u32 %v305_v33, 16  ;;  %v1487_v50 = vor.u32 %v1486_v49, %v1483_v21  ;;  %v1492_v7 = vrot.slane %v1490_v41, 5 }
  0xd9   : > { %v1446_v63 = vmax.bf16 %v1414_v45, %v304_v1  ;;  %v1350_v4 = vrot.slane %v1348_v55, 5  ;;  %v1477_v5 = vmax.bf16 %v1445_v36, %v2663_v28  ;;  %v1500_v58 = vshll.u32 %v306_v56, 16  ;;  %v340_v28 = vld [vmem:[%s1897_s10 + $0x84] sm:$0xf]  ;;  %s1806_s10 = smov [#allocation2]  }
  0xda   : > { %v967_v10 = vmax.bf16 %v935_v20, %v420_v2  ;;  %v1496_v16 = vrot.slane %v1494_v53, 4  ;;  %v1488_v3 = vrot.slane %v1487_v50, 4  ;;  %s1748_s11 = sshll.u32 %s1806_s10, 4  ;;  %s1749_s11 = int_to_ptr.vmem [resolvable:$false] %s1748_s11 }
  0xdb   : > { %v1478_v23 = vmax.bf16 %v1446_v63, %v339_v46  ;;  %v1351_v43 = vsel %vm1948_vm2, %v1346_v59, %v1350_v4  ;;  %v1535_v18 = vmax.bf16 %v1477_v5, %v839_v57  ;;  %v1502_v6 = vrot.slane %v1500_v58, 5  ;;  %s1750_s12 = scalar_lea.vmem %s1749_s11, 4096  ;;  %p1751_p0 = scmp.lt.s32.totalorder %s2719_s5, %s1749_s11 }
  0xdc   : > { %v1415_v14 = vmax.bf16 %v1351_v43, %v967_v10  ;;  %v1497_v51 = vor.u32 %v1496_v16, %v1492_v7  ;;  %v1493_v19 = vsel %vm1948_vm2, %v1488_v3, %v1492_v7  ;;  %p1752_p1 = scmp.lt.s32.totalorder %s1750_s12, %s1744_s9 }
  0xdd   : > { %1568 = vst.msk [vmem:[%s2032_s29 + $0x74] sm:$0xf] %vm1538_vm3, %v1535_v18  ;;  %v1536_v22 = vmax.bf16 %v1493_v19, %v1478_v23 }
  0xde   : > { %v1447_v11 = vmax.bf16 %v1415_v14, %v305_v33  ;;  %v1498_v12 = vrot.slane %v1497_v51, 4  ;;  %p1753_p2 = por %p1752_p1, %p1751_p0 }
  0xdf   : > { %1569 = vst.msk [vmem:[%s2032_s29 + $0x78] sm:$0xf] %vm1538_vm3, %v1536_v22 }
  0xe0   : > { %v1479_v26 = vmax.bf16 %v1447_v11, %v340_v28  ;;  %v1503_v47 = vsel %vm1948_vm2, %v1498_v12, %v1502_v6  ;;  %p1754_p3 = pnand %p1753_p2, %p1747_p13 }
  0xe2   : > { %v1537_v60 = vmax.bf16 %v1503_v47, %v1479_v26 }
  0xe4   : > { %1570 = vst.msk [vmem:[%s2032_s29 + $0x7c] sm:$0xf] %vm1538_vm3, %v1537_v60 }
  0xe5   : > { %1757 = shalt.err (!%p1754_p3)
}
  0xe6   : > { %s1758_s13 = scalar_lea.hbm %s2717_s8, 2048  ;;  %s1762_s22 = scalar_lea.hbm %s2769_s4, 4096 }
  0xe7   : > { %p1759_p4 = scmp.ne.s32.totalorder %s2717_s8, %s1758_s13  ;;  %p1763_p9 = scmp.lt.s32.totalorder %s2717_s8, %s2769_s4 }
  0xe8   : > { %p1764_p10 = scmp.lt.s32.totalorder %s1762_s22, %s1758_s13 }
  0xe9   : > { %p1760_p7 = pnand %p1759_p4, %p1872_p5 }
  0xea   : > { %p1765_p11 = por %p1764_p10, %p1763_p9 }
  0xeb   : > { %p1761_p8 = pneg %p1760_p7 }
  0xed   : > { %p1766_p12 = pnand %p1765_p11, %p1761_p8 }
  0xef   : > { %1769 = shalt.err (!%p1766_p12)
}
  0xf0   : > { %s1807_s28 = smov 64   ;;  %s1808_s29 = smov 4  }
  0xf1   : > { %1703 = dma.vmem_to_hbm [thread:$0]  (%p1872_p5), %s2719_s5, 2048, %s2717_s8, %s2725_s19, %s1807_s28, %s1807_s28, %s1808_s29  }
  0xf2 PF: > { %p1709_p13 = scmp.ge.s32.totalorder %s1804_s18, 2  ;;  %s1600_s30 = sand.u32 1, %s1792_s15  }
  0xf3   : > { %s1601_s6 = scalar_lea.sflag [#allocation3], %s1600_s30 }
  0xf4   : > { %p1706_p0 = pnand %p1709_p13, %p1876_p6 }
  0xf6   : > { %p1707_p1 = pneg %p1706_p0 }
  0xf8   : > { %1787 = dma.done.wait (%p1707_p1), %s1601_s6, 2048  }
  0xf9   : > { %1789 = vsyncadd (%p1707_p1), %s1601_s6, 4294965248  ;;  %p14_p2 = scmp.ge.s32.totalorder %s1859_s21, 4   ;;  %s2774_s15 = smov %s1796_s16 }
  0xfa   : > { %s2775_s16 = smov %s1800_s17  ;;  %s2776_s17 = smov %s1870_s24 }
  0xfb   : > { %s2777_s18 = smov %s1859_s21  ;;  %16 = sbr.rel (!%p14_p2) target bundleno = 3 (0x3), region = 80 }
 0x100   :  { %1606 = vsyncpa [#allocation3], 1 }
 0x101   :  { %1608 = vsyncpa [#allocation3 + $0x1], 1 }

</bundles_post_ra>
